<compile_context>
chip_gen: v5e
topology: v5e:2x2
jax: 0.10.0
libtpu: 0.0.40
codegen_flags: <defaults>
</compile_context>

<pallas_src>
import functools

import jax
import jax.numpy as jnp
from jax.experimental import pallas as pl
from jax.experimental.pallas import tpu as pltpu


def _round_up(x, m):
    return (x + m - 1) // m * m


# ----------------------------------------------------------------------------
# Pallas kernel: tiled matmul + f32 accumulation + fused bias / LeakyReLU
# ----------------------------------------------------------------------------
def conv_mm_kernel(p_ref, w_ref, b_ref, o_ref, acc_ref, *, apply_relu,
                   negative_slope):
    # p_ref: (TM, TK) bf16, w_ref: (TK, TN) bf16, b_ref: (1, TN) f32,
    # o_ref: (TM, TN) bf16/f32, acc_ref: (TM, TN) f32 scratch.
    k = pl.program_id(2)

    @pl.when(k == 0)
    def _():
        acc_ref[...] = jnp.zeros_like(acc_ref)

    acc_ref[...] += jnp.dot(
        p_ref[...], w_ref[...], preferred_element_type=jnp.float32
    )

    @pl.when(k == pl.num_programs(2) - 1)
    def _():
        acc = acc_ref[...] + b_ref[...]
        if apply_relu:
            acc = jnp.where(acc > 0, acc, negative_slope * acc)
        o_ref[...] = acc.astype(o_ref.dtype)


# ----------------------------------------------------------------------------
# Tile selection (divisor tiles, no over-padding)
# ----------------------------------------------------------------------------
def _pick_tk(K, max_tk=2048):
    """K padded to a 128 multiple; TK = padded K or an exact 128-mult divisor."""
    Kp = _round_up(K, 128)
    if Kp <= max_tk:
        return Kp, Kp
    q = Kp // 128
    best = 1
    for d in range(1, q + 1):
        if q % d == 0 and 128 * d <= max_tk:
            best = d
    return 128 * best, Kp


def _pick_tn(Cout, max_tn=256):
    """Never pad Cout. 128-mult divisor when possible, else full Cout."""
    if Cout % 128 == 0:
        m = Cout // 128
        best = 1
        for d in range(1, m + 1):
            if m % d == 0 and 128 * d <= max_tn:
                best = d
        return 128 * best
    return Cout


def _pick_tm(M, TK, TN):
    """Multiple of 8 that divides round_up(M, 8); grows for small-K/N layers
    to amortize per-step overhead, shrinks to keep >=4 M tiles (v7x 2 TCs)."""
    Mr = _round_up(M, 8)
    max_tm = 512
    while max_tm < 4096 and (TK + TN) * (max_tm * 2) * 2 <= 2 * 1024 * 1024:
        max_tm *= 2
    cap = min(max_tm, Mr)
    TM = 8
    for t in range(8, cap + 1, 8):
        if Mr % t == 0:
            TM = t
    while TM >= 512 and Mr // TM < 4:
        TM //= 2
    return TM, Mr


def conv_matmul(patches, w2d, b2d, apply_relu, out_dtype):
    """patches: (M, K) bf16, w2d: (K, Cout) f32, b2d: (1, Cout) f32.
    Runs the tiled MXU kernel; output is (M, Cout) in out_dtype."""
    M, K = patches.shape
    Cout = w2d.shape[1]

    TK, Kp = _pick_tk(K)
    TN = _pick_tn(Cout)
    TM, Mp = _pick_tm(M, TK, TN)

    # Pad only when actually needed (usually a no-op for real shapes).
    if Mp != M or Kp != K:
        patches = jnp.pad(patches, ((0, Mp - M), (0, Kp - K)))
    if Kp != K:
        w2d = jnp.pad(w2d, ((0, Kp - K), (0, 0)))
    w2d = w2d.astype(jnp.bfloat16)
    b2d = b2d.astype(jnp.float32)

    grid = (Mp // TM, Cout // TN, Kp // TK)

    # Honest VMEM estimate: double-buffered bf16 inputs + bias + f32 acc + out.
    out_bytes = jnp.dtype(out_dtype).itemsize
    est = (2 * TM * TK * 2 + 2 * TK * TN * 2 + 2 * TN * 4
           + TM * TN * 4 + 2 * TM * TN * out_bytes)
    vmem_limit = int(min(64 * 1024 * 1024, max(2 * est, 8 * 1024 * 1024)))

    kernel = functools.partial(
        conv_mm_kernel, apply_relu=apply_relu, negative_slope=0.2
    )
    out = pl.pallas_call(
        kernel,
        out_shape=jax.ShapeDtypeStruct((Mp, Cout), out_dtype),
        grid_spec=pltpu.PrefetchScalarGridSpec(
            num_scalar_prefetch=0,
            grid=grid,
            in_specs=[
                pl.BlockSpec((TM, TK), lambda i, j, k: (i, k)),
                pl.BlockSpec((TK, TN), lambda i, j, k: (k, j)),
                pl.BlockSpec((1, TN), lambda i, j, k: (0, j)),
            ],
            out_specs=pl.BlockSpec((TM, TN), lambda i, j, k: (i, j)),
            scratch_shapes=[pltpu.VMEM((TM, TN), jnp.float32)],
        ),
        compiler_params=pltpu.CompilerParams(
            dimension_semantics=("parallel", "parallel", "arbitrary"),
            vmem_limit_bytes=vmem_limit,
        ),
    )(patches, w2d, b2d)
    if Mp != M:
        out = out[:M]
    return out


# ----------------------------------------------------------------------------
# Glue: im2col patch extraction in NHWC (bf16 in -> bf16 patches, written once)
# ----------------------------------------------------------------------------
def im2col_nhwc(x, ksize, stride, padding):
    N, H, W, C = x.shape
    Ho = (H + 2 * padding - ksize) // stride + 1
    Wo = (W + 2 * padding - ksize) // stride + 1
    xp = jnp.pad(x, ((0, 0), (padding, padding), (padding, padding), (0, 0)))
    slices = []
    for i in range(ksize):
        for j in range(ksize):
            slices.append(
                xp[:, i : i + stride * Ho : stride, j : j + stride * Wo : stride, :]
            )
    # (N, Ho, Wo, C, kh*kw): feature index = c*(kh*kw) + i*kw + j, matching
    # PyTorch's (Cout, Cin, kh, kw).reshape(Cout, -1) weight flattening.
    patches = jnp.stack(slices, axis=-1)
    patches = patches.reshape(N * Ho * Wo, C * ksize * ksize)
    return patches, (N, Ho, Wo)


def conv2d_pallas_nhwc(x, w, b, stride, padding, apply_relu, out_dtype):
    """x: (N, H, W, Cin) NHWC bf16, w: (Cout, Cin, kh, kw) f32, b: (Cout,) f32."""
    Cout, Cin, kh, kw = w.shape
    patches, (N, Ho, Wo) = im2col_nhwc(x, kh, stride, padding)
    w2d = w.reshape(Cout, Cin * kh * kw).T            # (K, Cout)
    b2d = b.reshape(1, Cout)
    out = conv_matmul(patches, w2d, b2d, apply_relu, out_dtype)
    return out.reshape(N, Ho, Wo, Cout)


# ----------------------------------------------------------------------------
# Spectral normalization of the weights (PyTorch default: 1 power iteration)
# ----------------------------------------------------------------------------
def spectral_normalize(w, key, n_power_iterations=1, eps=1e-12):
    cout = w.shape[0]
    w_mat = w.reshape(cout, -1)
    u = jax.random.normal(key, (cout,), dtype=jnp.float32)
    u = u / (jnp.linalg.norm(u) + eps)
    v = None
    for _ in range(max(n_power_iterations, 1)):
        v = w_mat.T @ u
        v = v / (jnp.linalg.norm(v) + eps)
        u = w_mat @ v
        u = u / (jnp.linalg.norm(u) + eps)
    sigma = u @ (w_mat @ v)
    return w / sigma


# ----------------------------------------------------------------------------
# Discriminator config, parameters + forward
# ----------------------------------------------------------------------------
def discriminator_layer_cfgs(hidden_channels):
    hc = hidden_channels
    # (Cout, Cin, ksize, stride, padding)
    return (
        (hc,     3,      5, 2, 2),
        (hc * 2, hc,     5, 2, 2),
        (hc * 4, hc * 2, 5, 2, 2),
        (hc * 4, hc * 4, 5, 2, 2),
        (hc * 4, hc * 4, 5, 2, 2),
        (1,      hc * 4, 3, 1, 1),
    )


def init_discriminator_params(key, layer_cfgs):
    params = []
    for idx, (cout, cin, k, _s, _p) in enumerate(layer_cfgs):
        kw_key, kb_key, ku_key = jax.random.split(jax.random.fold_in(key, idx), 3)
        fan_in = cin * k * k
        w = jax.random.normal(kw_key, (cout, cin, k, k), dtype=jnp.float32)
        w = w * (1.0 / jnp.sqrt(fan_in))
        b = jax.random.normal(kb_key, (cout,), dtype=jnp.float32) * 0.01
        w_sn = spectral_normalize(w, ku_key)
        params.append({"w": w_sn, "b": b})
    return params


def make_discriminator_forward(layer_cfgs):
    cfgs = tuple(layer_cfgs)

    @jax.jit
    def forward(params, x):
        # x: (N, 3, H, W) NCHW f32 at the module boundary (matches PyTorch).
        # Single transpose + bf16 cast; NHWC bf16 between layers.
        x = jnp.transpose(x, (0, 2, 3, 1)).astype(jnp.bfloat16)
        for layer, (cout, _cin, _k, stride, pad) in zip(params, cfgs):
            last = cout == 1
            x = conv2d_pallas_nhwc(
                x, layer["w"], layer["b"], stride, pad,
                apply_relu=not last,
                out_dtype=jnp.float32 if last else jnp.bfloat16,
            )
        # back to NCHW so nn.Flatten over (C, H, W) order is preserved
        x = jnp.transpose(x, (0, 3, 1, 2))
        n = x.shape[0]
        return x.reshape(n, -1)

    return forward


# ----------------------------------------------------------------------------
if __name__ == "__main__":
    key = jax.random.PRNGKey(0)
    pkey, xkey = jax.random.split(key)

    hidden_channels = 8           # small stand-in for the default 64
    N, H, W = 2, 16, 16           # input channels must be 3 per the module
    x = jax.random.normal(xkey, (N, 3, H, W), dtype=jnp.float32)

    cfgs = discriminator_layer_cfgs(hidden_channels)
    params = init_discriminator_params(pkey, cfgs)
    forward = make_discriminator_forward(cfgs)

    out = forward(params, x)
    out = jax.block_until_ready(out)

    # 16 -> 8 -> 4 -> 2 -> 1 -> 1 (stride-2 convs), then 3x3 stride-1 keeps 1x1
    assert out.shape == (N, 1), out.shape
    print("KERNEL_OK")
</pallas_src>

<mosaic_0001>
module attributes {stable_mosaic.version = 11 : i64} {
  func.func @conv_mm_kernel(%arg0: i32, %arg1: i32, %arg2: i32, %arg3: memref<128x128xbf16, #tpu.memory_space<vmem>>, %arg4: memref<128x8xbf16, #tpu.memory_space<vmem>>, %arg5: memref<1x8xf32, #tpu.memory_space<vmem>>, %arg6: memref<128x8xbf16, #tpu.memory_space<vmem>>, %arg7: memref<128x8xf32, #tpu.memory_space<vmem>>) attributes {dimension_semantics = [#tpu.dimension_semantics<parallel>, #tpu.dimension_semantics<parallel>, #tpu.dimension_semantics<arbitrary>], iteration_bounds = array<i64: 1, 1, 1>, scalar_prefetch = 0 : i64, scratch_operands = 1 : i64, tpu.core_type = #tpu.core_type<tc>, window_params = [{transform_indices = @transform_0, window_bounds = array<i64: 128, 128>}, {transform_indices = @transform_1, window_bounds = array<i64: 128, 8>}, {transform_indices = @transform_2, window_bounds = array<i64: 1, 8>}, {transform_indices = @transform_3, window_bounds = array<i64: 128, 8>}]} {
    %c0_i32 = arith.constant 0 : i32
    %0 = arith.cmpi eq, %arg2, %c0_i32 : i32
    %1 = arith.extui %0 : i1 to i32
    %c0_i32_0 = arith.constant 0 : i32
    %2 = arith.cmpi ne, %1, %c0_i32_0 : i32
    scf.if %2 {
      %cst_10 = arith.constant 0.000000e+00 : f32
      %12 = vector.broadcast %cst_10 : f32 to vector<128x8xf32>
      %c0_11 = arith.constant 0 : index
      %c0_12 = arith.constant 0 : index
      %13 = vector.load %arg7[%c0_11, %c0_12] : memref<128x8xf32, #tpu.memory_space<vmem>>, vector<128x8xf32>
      tpu.vector_store %arg7[%c0_11, %c0_12], %12 {strides = array<i32>} : memref<128x8xf32, #tpu.memory_space<vmem>>, vector<128x8xf32>,
    } else {
    }
    %c0 = arith.constant 0 : index
    %c0_1 = arith.constant 0 : index
    %3 = vector.load %arg7[%c0, %c0_1] : memref<128x8xf32, #tpu.memory_space<vmem>>, vector<128x8xf32>
    %c0_2 = arith.constant 0 : index
    %c0_3 = arith.constant 0 : index
    %4 = vector.load %arg3[%c0_2, %c0_3] : memref<128x128xbf16, #tpu.memory_space<vmem>>, vector<128x128xbf16>
    %c0_4 = arith.constant 0 : index
    %c0_5 = arith.constant 0 : index
    %5 = vector.load %arg4[%c0_4, %c0_5] : memref<128x8xbf16, #tpu.memory_space<vmem>>, vector<128x8xbf16>
    %cst = arith.constant dense<0.000000e+00> : vector<128x8xf32>
    %6 = tpu.matmul %4, %5, %cst {dimension_numbers = #tpu.dot_dimension_numbers<[1], [0], [0], [1], [0, 0, 1, 1], [], []>} : vector<128x128xbf16>, vector<128x8xbf16>, vector<128x8xf32> -> vector<128x8xf32>
    %7 = arith.addf %3, %6 : vector<128x8xf32>
    %c0_6 = arith.constant 0 : index
    %c0_7 = arith.constant 0 : index
    %8 = vector.load %arg7[%c0_6, %c0_7] : memref<128x8xf32, #tpu.memory_space<vmem>>, vector<128x8xf32>
    tpu.vector_store %arg7[%c0_6, %c0_7], %7 {strides = array<i32>} : memref<128x8xf32, #tpu.memory_space<vmem>>, vector<128x8xf32>,
    %c0_i32_8 = arith.constant 0 : i32
    %9 = arith.cmpi eq, %arg2, %c0_i32_8 : i32
    %10 = arith.extui %9 : i1 to i32
    %c0_i32_9 = arith.constant 0 : i32
    %11 = arith.cmpi ne, %10, %c0_i32_9 : i32
    scf.if %11 {
      %c0_10 = arith.constant 0 : index
      %c0_11 = arith.constant 0 : index
      %12 = vector.load %arg7[%c0_10, %c0_11] : memref<128x8xf32, #tpu.memory_space<vmem>>, vector<128x8xf32>
      %c0_12 = arith.constant 0 : index
      %c0_13 = arith.constant 0 : index
      %13 = vector.load %arg5[%c0_12, %c0_13] : memref<1x8xf32, #tpu.memory_space<vmem>>, vector<1x8xf32>
      %14 = vector.broadcast %13 : vector<1x8xf32> to vector<128x8xf32>
      %15 = arith.addf %12, %14 : vector<128x8xf32>
      %cst_14 = arith.constant 0.000000e+00 : f32
      %16 = vector.broadcast %cst_14 : f32 to vector<128x8xf32>
      %17 = arith.cmpf ogt, %15, %16 : vector<128x8xf32>
      %cst_15 = arith.constant 2.000000e-01 : f32
      %18 = vector.broadcast %cst_15 : f32 to vector<128x8xf32>
      %19 = arith.mulf %18, %15 : vector<128x8xf32>
      %20 = arith.select %17, %15, %19 : vector<128x8xi1>, vector<128x8xf32>
      %21 = arith.truncf %20 : vector<128x8xf32> to vector<128x8xbf16>
      %c0_16 = arith.constant 0 : index
      %c0_17 = arith.constant 0 : index
      %22 = vector.load %arg6[%c0_16, %c0_17] : memref<128x8xbf16, #tpu.memory_space<vmem>>, vector<128x8xbf16>
      tpu.vector_store %arg6[%c0_16, %c0_17], %21 {strides = array<i32>} : memref<128x8xbf16, #tpu.memory_space<vmem>>, vector<128x8xbf16>,
    } else {
    }
    return
  }
  func.func @transform_0(%arg0: i32, %arg1: i32, %arg2: i32) -> (i32, i32) {
    %c0_i32 = arith.constant 0 : i32
    return %arg0, %arg2 : i32, i32
  }
  func.func @transform_1(%arg0: i32, %arg1: i32, %arg2: i32) -> (i32, i32) {
    %c0_i32 = arith.constant 0 : i32
    return %arg2, %arg1 : i32, i32
  }
  func.func @transform_2(%arg0: i32, %arg1: i32, %arg2: i32) -> (i32, i32) {
    %c0_i32 = arith.constant 0 : i32
    %c0_i32_0 = arith.constant 0 : i32
    return %c0_i32, %arg1 : i32, i32
  }
  func.func @transform_3(%arg0: i32, %arg1: i32, %arg2: i32) -> (i32, i32) {
    %c0_i32 = arith.constant 0 : i32
    return %arg0, %arg1 : i32, i32
  }
}

module attributes {stable_mosaic.version = 11 : i64} {
  func.func @conv_mm_kernel(%arg0: i32, %arg1: i32, %arg2: i32, %arg3: memref<32x256xbf16, #tpu.memory_space<vmem>>, %arg4: memref<256x16xbf16, #tpu.memory_space<vmem>>, %arg5: memref<1x16xf32, #tpu.memory_space<vmem>>, %arg6: memref<32x16xbf16, #tpu.memory_space<vmem>>, %arg7: memref<32x16xf32, #tpu.memory_space<vmem>>) attributes {dimension_semantics = [#tpu.dimension_semantics<parallel>, #tpu.dimension_semantics<parallel>, #tpu.dimension_semantics<arbitrary>], iteration_bounds = array<i64: 1, 1, 1>, scalar_prefetch = 0 : i64, scratch_operands = 1 : i64, tpu.core_type = #tpu.core_type<tc>, window_params = [{transform_indices = @transform_0, window_bounds = array<i64: 32, 256>}, {transform_indices = @transform_1, window_bounds = array<i64: 256, 16>}, {transform_indices = @transform_2, window_bounds = array<i64: 1, 16>}, {transform_indices = @transform_3, window_bounds = array<i64: 32, 16>}]} {
    %c0_i32 = arith.constant 0 : i32
    %0 = arith.cmpi eq, %arg2, %c0_i32 : i32
    %1 = arith.extui %0 : i1 to i32
    %c0_i32_0 = arith.constant 0 : i32
    %2 = arith.cmpi ne, %1, %c0_i32_0 : i32
    scf.if %2 {
      %cst_10 = arith.constant 0.000000e+00 : f32
      %12 = vector.broadcast %cst_10 : f32 to vector<32x16xf32>
      %c0_11 = arith.constant 0 : index
      %c0_12 = arith.constant 0 : index
      %13 = vector.load %arg7[%c0_11, %c0_12] : memref<32x16xf32, #tpu.memory_space<vmem>>, vector<32x16xf32>
      tpu.vector_store %arg7[%c0_11, %c0_12], %12 {strides = array<i32>} : memref<32x16xf32, #tpu.memory_space<vmem>>, vector<32x16xf32>,
    } else {
    }
    %c0 = arith.constant 0 : index
    %c0_1 = arith.constant 0 : index
    %3 = vector.load %arg7[%c0, %c0_1] : memref<32x16xf32, #tpu.memory_space<vmem>>, vector<32x16xf32>
    %c0_2 = arith.constant 0 : index
    %c0_3 = arith.constant 0 : index
    %4 = vector.load %arg3[%c0_2, %c0_3] : memref<32x256xbf16, #tpu.memory_space<vmem>>, vector<32x256xbf16>
    %c0_4 = arith.constant 0 : index
    %c0_5 = arith.constant 0 : index
    %5 = vector.load %arg4[%c0_4, %c0_5] : memref<256x16xbf16, #tpu.memory_space<vmem>>, vector<256x16xbf16>
    %cst = arith.constant dense<0.000000e+00> : vector<32x16xf32>
    %6 = tpu.matmul %4, %5, %cst {dimension_numbers = #tpu.dot_dimension_numbers<[1], [0], [0], [1], [0, 0, 1, 1], [], []>} : vector<32x256xbf16>, vector<256x16xbf16>, vector<32x16xf32> -> vector<32x16xf32>
    %7 = arith.addf %3, %6 : vector<32x16xf32>
    %c0_6 = arith.constant 0 : index
    %c0_7 = arith.constant 0 : index
    %8 = vector.load %arg7[%c0_6, %c0_7] : memref<32x16xf32, #tpu.memory_space<vmem>>, vector<32x16xf32>
    tpu.vector_store %arg7[%c0_6, %c0_7], %7 {strides = array<i32>} : memref<32x16xf32, #tpu.memory_space<vmem>>, vector<32x16xf32>,
    %c0_i32_8 = arith.constant 0 : i32
    %9 = arith.cmpi eq, %arg2, %c0_i32_8 : i32
    %10 = arith.extui %9 : i1 to i32
    %c0_i32_9 = arith.constant 0 : i32
    %11 = arith.cmpi ne, %10, %c0_i32_9 : i32
    scf.if %11 {
      %c0_10 = arith.constant 0 : index
      %c0_11 = arith.constant 0 : index
      %12 = vector.load %arg7[%c0_10, %c0_11] : memref<32x16xf32, #tpu.memory_space<vmem>>, vector<32x16xf32>
      %c0_12 = arith.constant 0 : index
      %c0_13 = arith.constant 0 : index
      %13 = vector.load %arg5[%c0_12, %c0_13] : memref<1x16xf32, #tpu.memory_space<vmem>>, vector<1x16xf32>
      %14 = vector.broadcast %13 : vector<1x16xf32> to vector<32x16xf32>
      %15 = arith.addf %12, %14 : vector<32x16xf32>
      %cst_14 = arith.constant 0.000000e+00 : f32
      %16 = vector.broadcast %cst_14 : f32 to vector<32x16xf32>
      %17 = arith.cmpf ogt, %15, %16 : vector<32x16xf32>
      %cst_15 = arith.constant 2.000000e-01 : f32
      %18 = vector.broadcast %cst_15 : f32 to vector<32x16xf32>
      %19 = arith.mulf %18, %15 : vector<32x16xf32>
      %20 = arith.select %17, %15, %19 : vector<32x16xi1>, vector<32x16xf32>
      %21 = arith.truncf %20 : vector<32x16xf32> to vector<32x16xbf16>
      %c0_16 = arith.constant 0 : index
      %c0_17 = arith.constant 0 : index
      %22 = vector.load %arg6[%c0_16, %c0_17] : memref<32x16xbf16, #tpu.memory_space<vmem>>, vector<32x16xbf16>
      tpu.vector_store %arg6[%c0_16, %c0_17], %21 {strides = array<i32>} : memref<32x16xbf16, #tpu.memory_space<vmem>>, vector<32x16xbf16>,
    } else {
    }
    return
  }
  func.func @transform_0(%arg0: i32, %arg1: i32, %arg2: i32) -> (i32, i32) {
    %c0_i32 = arith.constant 0 : i32
    return %arg0, %arg2 : i32, i32
  }
  func.func @transform_1(%arg0: i32, %arg1: i32, %arg2: i32) -> (i32, i32) {
    %c0_i32 = arith.constant 0 : i32
    return %arg2, %arg1 : i32, i32
  }
  func.func @transform_2(%arg0: i32, %arg1: i32, %arg2: i32) -> (i32, i32) {
    %c0_i32 = arith.constant 0 : i32
    %c0_i32_0 = arith.constant 0 : i32
    return %c0_i32, %arg1 : i32, i32
  }
  func.func @transform_3(%arg0: i32, %arg1: i32, %arg2: i32) -> (i32, i32) {
    %c0_i32 = arith.constant 0 : i32
    return %arg0, %arg1 : i32, i32
  }
}

module attributes {stable_mosaic.version = 11 : i64} {
  func.func @conv_mm_kernel(%arg0: i32, %arg1: i32, %arg2: i32, %arg3: memref<8x512xbf16, #tpu.memory_space<vmem>>, %arg4: memref<512x32xbf16, #tpu.memory_space<vmem>>, %arg5: memref<1x32xf32, #tpu.memory_space<vmem>>, %arg6: memref<8x32xbf16, #tpu.memory_space<vmem>>, %arg7: memref<8x32xf32, #tpu.memory_space<vmem>>) attributes {dimension_semantics = [#tpu.dimension_semantics<parallel>, #tpu.dimension_semantics<parallel>, #tpu.dimension_semantics<arbitrary>], iteration_bounds = array<i64: 1, 1, 1>, scalar_prefetch = 0 : i64, scratch_operands = 1 : i64, tpu.core_type = #tpu.core_type<tc>, window_params = [{transform_indices = @transform_0, window_bounds = array<i64: 8, 512>}, {transform_indices = @transform_1, window_bounds = array<i64: 512, 32>}, {transform_indices = @transform_2, window_bounds = array<i64: 1, 32>}, {transform_indices = @transform_3, window_bounds = array<i64: 8, 32>}]} {
    %c0_i32 = arith.constant 0 : i32
    %0 = arith.cmpi eq, %arg2, %c0_i32 : i32
    %1 = arith.extui %0 : i1 to i32
    %c0_i32_0 = arith.constant 0 : i32
    %2 = arith.cmpi ne, %1, %c0_i32_0 : i32
    scf.if %2 {
      %cst_10 = arith.constant 0.000000e+00 : f32
      %12 = vector.broadcast %cst_10 : f32 to vector<8x32xf32>
      %c0_11 = arith.constant 0 : index
      %c0_12 = arith.constant 0 : index
      %13 = vector.load %arg7[%c0_11, %c0_12] : memref<8x32xf32, #tpu.memory_space<vmem>>, vector<8x32xf32>
      tpu.vector_store %arg7[%c0_11, %c0_12], %12 {strides = array<i32>} : memref<8x32xf32, #tpu.memory_space<vmem>>, vector<8x32xf32>,
    } else {
    }
    %c0 = arith.constant 0 : index
    %c0_1 = arith.constant 0 : index
    %3 = vector.load %arg7[%c0, %c0_1] : memref<8x32xf32, #tpu.memory_space<vmem>>, vector<8x32xf32>
    %c0_2 = arith.constant 0 : index
    %c0_3 = arith.constant 0 : index
    %4 = vector.load %arg3[%c0_2, %c0_3] : memref<8x512xbf16, #tpu.memory_space<vmem>>, vector<8x512xbf16>
    %c0_4 = arith.constant 0 : index
    %c0_5 = arith.constant 0 : index
    %5 = vector.load %arg4[%c0_4, %c0_5] : memref<512x32xbf16, #tpu.memory_space<vmem>>, vector<512x32xbf16>
    %cst = arith.constant dense<0.000000e+00> : vector<8x32xf32>
    %6 = tpu.matmul %4, %5, %cst {dimension_numbers = #tpu.dot_dimension_numbers<[1], [0], [0], [1], [0, 0, 1, 1], [], []>} : vector<8x512xbf16>, vector<512x32xbf16>, vector<8x32xf32> -> vector<8x32xf32>
    %7 = arith.addf %3, %6 : vector<8x32xf32>
    %c0_6 = arith.constant 0 : index
    %c0_7 = arith.constant 0 : index
    %8 = vector.load %arg7[%c0_6, %c0_7] : memref<8x32xf32, #tpu.memory_space<vmem>>, vector<8x32xf32>
    tpu.vector_store %arg7[%c0_6, %c0_7], %7 {strides = array<i32>} : memref<8x32xf32, #tpu.memory_space<vmem>>, vector<8x32xf32>,
    %c0_i32_8 = arith.constant 0 : i32
    %9 = arith.cmpi eq, %arg2, %c0_i32_8 : i32
    %10 = arith.extui %9 : i1 to i32
    %c0_i32_9 = arith.constant 0 : i32
    %11 = arith.cmpi ne, %10, %c0_i32_9 : i32
    scf.if %11 {
      %c0_10 = arith.constant 0 : index
      %c0_11 = arith.constant 0 : index
      %12 = vector.load %arg7[%c0_10, %c0_11] : memref<8x32xf32, #tpu.memory_space<vmem>>, vector<8x32xf32>
      %c0_12 = arith.constant 0 : index
      %c0_13 = arith.constant 0 : index
      %13 = vector.load %arg5[%c0_12, %c0_13] : memref<1x32xf32, #tpu.memory_space<vmem>>, vector<1x32xf32>
      %14 = vector.broadcast %13 : vector<1x32xf32> to vector<8x32xf32>
      %15 = arith.addf %12, %14 : vector<8x32xf32>
      %cst_14 = arith.constant 0.000000e+00 : f32
      %16 = vector.broadcast %cst_14 : f32 to vector<8x32xf32>
      %17 = arith.cmpf ogt, %15, %16 : vector<8x32xf32>
      %cst_15 = arith.constant 2.000000e-01 : f32
      %18 = vector.broadcast %cst_15 : f32 to vector<8x32xf32>
      %19 = arith.mulf %18, %15 : vector<8x32xf32>
      %20 = arith.select %17, %15, %19 : vector<8x32xi1>, vector<8x32xf32>
      %21 = arith.truncf %20 : vector<8x32xf32> to vector<8x32xbf16>
      %c0_16 = arith.constant 0 : index
      %c0_17 = arith.constant 0 : index
      %22 = vector.load %arg6[%c0_16, %c0_17] : memref<8x32xbf16, #tpu.memory_space<vmem>>, vector<8x32xbf16>
      tpu.vector_store %arg6[%c0_16, %c0_17], %21 {strides = array<i32>} : memref<8x32xbf16, #tpu.memory_space<vmem>>, vector<8x32xbf16>,
    } else {
    }
    return
  }
  func.func @transform_0(%arg0: i32, %arg1: i32, %arg2: i32) -> (i32, i32) {
    %c0_i32 = arith.constant 0 : i32
    return %arg0, %arg2 : i32, i32
  }
  func.func @transform_1(%arg0: i32, %arg1: i32, %arg2: i32) -> (i32, i32) {
    %c0_i32 = arith.constant 0 : i32
    return %arg2, %arg1 : i32, i32
  }
  func.func @transform_2(%arg0: i32, %arg1: i32, %arg2: i32) -> (i32, i32) {
    %c0_i32 = arith.constant 0 : i32
    %c0_i32_0 = arith.constant 0 : i32
    return %c0_i32, %arg1 : i32, i32
  }
  func.func @transform_3(%arg0: i32, %arg1: i32, %arg2: i32) -> (i32, i32) {
    %c0_i32 = arith.constant 0 : i32
    return %arg0, %arg1 : i32, i32
  }
}

module attributes {stable_mosaic.version = 11 : i64} {
  func.func @conv_mm_kernel(%arg0: i32, %arg1: i32, %arg2: i32, %arg3: memref<8x896xbf16, #tpu.memory_space<vmem>>, %arg4: memref<896x32xbf16, #tpu.memory_space<vmem>>, %arg5: memref<1x32xf32, #tpu.memory_space<vmem>>, %arg6: memref<8x32xbf16, #tpu.memory_space<vmem>>, %arg7: memref<8x32xf32, #tpu.memory_space<vmem>>) attributes {dimension_semantics = [#tpu.dimension_semantics<parallel>, #tpu.dimension_semantics<parallel>, #tpu.dimension_semantics<arbitrary>], iteration_bounds = array<i64: 1, 1, 1>, scalar_prefetch = 0 : i64, scratch_operands = 1 : i64, tpu.core_type = #tpu.core_type<tc>, window_params = [{transform_indices = @transform_0, window_bounds = array<i64: 8, 896>}, {transform_indices = @transform_1, window_bounds = array<i64: 896, 32>}, {transform_indices = @transform_2, window_bounds = array<i64: 1, 32>}, {transform_indices = @transform_3, window_bounds = array<i64: 8, 32>}]} {
    %c0_i32 = arith.constant 0 : i32
    %0 = arith.cmpi eq, %arg2, %c0_i32 : i32
    %1 = arith.extui %0 : i1 to i32
    %c0_i32_0 = arith.constant 0 : i32
    %2 = arith.cmpi ne, %1, %c0_i32_0 : i32
    scf.if %2 {
      %cst_10 = arith.constant 0.000000e+00 : f32
      %12 = vector.broadcast %cst_10 : f32 to vector<8x32xf32>
      %c0_11 = arith.constant 0 : index
      %c0_12 = arith.constant 0 : index
      %13 = vector.load %arg7[%c0_11, %c0_12] : memref<8x32xf32, #tpu.memory_space<vmem>>, vector<8x32xf32>
      tpu.vector_store %arg7[%c0_11, %c0_12], %12 {strides = array<i32>} : memref<8x32xf32, #tpu.memory_space<vmem>>, vector<8x32xf32>,
    } else {
    }
    %c0 = arith.constant 0 : index
    %c0_1 = arith.constant 0 : index
    %3 = vector.load %arg7[%c0, %c0_1] : memref<8x32xf32, #tpu.memory_space<vmem>>, vector<8x32xf32>
    %c0_2 = arith.constant 0 : index
    %c0_3 = arith.constant 0 : index
    %4 = vector.load %arg3[%c0_2, %c0_3] : memref<8x896xbf16, #tpu.memory_space<vmem>>, vector<8x896xbf16>
    %c0_4 = arith.constant 0 : index
    %c0_5 = arith.constant 0 : index
    %5 = vector.load %arg4[%c0_4, %c0_5] : memref<896x32xbf16, #tpu.memory_space<vmem>>, vector<896x32xbf16>
    %cst = arith.constant dense<0.000000e+00> : vector<8x32xf32>
    %6 = tpu.matmul %4, %5, %cst {dimension_numbers = #tpu.dot_dimension_numbers<[1], [0], [0], [1], [0, 0, 1, 1], [], []>} : vector<8x896xbf16>, vector<896x32xbf16>, vector<8x32xf32> -> vector<8x32xf32>
    %7 = arith.addf %3, %6 : vector<8x32xf32>
    %c0_6 = arith.constant 0 : index
    %c0_7 = arith.constant 0 : index
    %8 = vector.load %arg7[%c0_6, %c0_7] : memref<8x32xf32, #tpu.memory_space<vmem>>, vector<8x32xf32>
    tpu.vector_store %arg7[%c0_6, %c0_7], %7 {strides = array<i32>} : memref<8x32xf32, #tpu.memory_space<vmem>>, vector<8x32xf32>,
    %c0_i32_8 = arith.constant 0 : i32
    %9 = arith.cmpi eq, %arg2, %c0_i32_8 : i32
    %10 = arith.extui %9 : i1 to i32
    %c0_i32_9 = arith.constant 0 : i32
    %11 = arith.cmpi ne, %10, %c0_i32_9 : i32
    scf.if %11 {
      %c0_10 = arith.constant 0 : index
      %c0_11 = arith.constant 0 : index
      %12 = vector.load %arg7[%c0_10, %c0_11] : memref<8x32xf32, #tpu.memory_space<vmem>>, vector<8x32xf32>
      %c0_12 = arith.constant 0 : index
      %c0_13 = arith.constant 0 : index
      %13 = vector.load %arg5[%c0_12, %c0_13] : memref<1x32xf32, #tpu.memory_space<vmem>>, vector<1x32xf32>
      %14 = vector.broadcast %13 : vector<1x32xf32> to vector<8x32xf32>
      %15 = arith.addf %12, %14 : vector<8x32xf32>
      %cst_14 = arith.constant 0.000000e+00 : f32
      %16 = vector.broadcast %cst_14 : f32 to vector<8x32xf32>
      %17 = arith.cmpf ogt, %15, %16 : vector<8x32xf32>
      %cst_15 = arith.constant 2.000000e-01 : f32
      %18 = vector.broadcast %cst_15 : f32 to vector<8x32xf32>
      %19 = arith.mulf %18, %15 : vector<8x32xf32>
      %20 = arith.select %17, %15, %19 : vector<8x32xi1>, vector<8x32xf32>
      %21 = arith.truncf %20 : vector<8x32xf32> to vector<8x32xbf16>
      %c0_16 = arith.constant 0 : index
      %c0_17 = arith.constant 0 : index
      %22 = vector.load %arg6[%c0_16, %c0_17] : memref<8x32xbf16, #tpu.memory_space<vmem>>, vector<8x32xbf16>
      tpu.vector_store %arg6[%c0_16, %c0_17], %21 {strides = array<i32>} : memref<8x32xbf16, #tpu.memory_space<vmem>>, vector<8x32xbf16>,
    } else {
    }
    return
  }
  func.func @transform_0(%arg0: i32, %arg1: i32, %arg2: i32) -> (i32, i32) {
    %c0_i32 = arith.constant 0 : i32
    return %arg0, %arg2 : i32, i32
  }
  func.func @transform_1(%arg0: i32, %arg1: i32, %arg2: i32) -> (i32, i32) {
    %c0_i32 = arith.constant 0 : i32
    return %arg2, %arg1 : i32, i32
  }
  func.func @transform_2(%arg0: i32, %arg1: i32, %arg2: i32) -> (i32, i32) {
    %c0_i32 = arith.constant 0 : i32
    %c0_i32_0 = arith.constant 0 : i32
    return %c0_i32, %arg1 : i32, i32
  }
  func.func @transform_3(%arg0: i32, %arg1: i32, %arg2: i32) -> (i32, i32) {
    %c0_i32 = arith.constant 0 : i32
    return %arg0, %arg1 : i32, i32
  }
}

module attributes {stable_mosaic.version = 11 : i64} {
  func.func @conv_mm_kernel(%arg0: i32, %arg1: i32, %arg2: i32, %arg3: memref<8x384xbf16, #tpu.memory_space<vmem>>, %arg4: memref<384x1xbf16, #tpu.memory_space<vmem>>, %arg5: memref<1x1xf32, #tpu.memory_space<vmem>>, %arg6: memref<8x1xf32, #tpu.memory_space<vmem>>, %arg7: memref<8x1xf32, #tpu.memory_space<vmem>>) attributes {dimension_semantics = [#tpu.dimension_semantics<parallel>, #tpu.dimension_semantics<parallel>, #tpu.dimension_semantics<arbitrary>], iteration_bounds = array<i64: 1, 1, 1>, scalar_prefetch = 0 : i64, scratch_operands = 1 : i64, tpu.core_type = #tpu.core_type<tc>, window_params = [{transform_indices = @transform_0, window_bounds = array<i64: 8, 384>}, {transform_indices = @transform_1, window_bounds = array<i64: 384, 1>}, {transform_indices = @transform_2, window_bounds = array<i64: 1, 1>}, {transform_indices = @transform_3, window_bounds = array<i64: 8, 1>}]} {
    %c0_i32 = arith.constant 0 : i32
    %0 = arith.cmpi eq, %arg2, %c0_i32 : i32
    %1 = arith.extui %0 : i1 to i32
    %c0_i32_0 = arith.constant 0 : i32
    %2 = arith.cmpi ne, %1, %c0_i32_0 : i32
    scf.if %2 {
      %cst_10 = arith.constant 0.000000e+00 : f32
      %12 = vector.broadcast %cst_10 : f32 to vector<8x1xf32>
      %c0_11 = arith.constant 0 : index
      %c0_12 = arith.constant 0 : index
      %13 = vector.load %arg7[%c0_11, %c0_12] : memref<8x1xf32, #tpu.memory_space<vmem>>, vector<8x1xf32>
      tpu.vector_store %arg7[%c0_11, %c0_12], %12 {strides = array<i32>} : memref<8x1xf32, #tpu.memory_space<vmem>>, vector<8x1xf32>,
    } else {
    }
    %c0 = arith.constant 0 : index
    %c0_1 = arith.constant 0 : index
    %3 = vector.load %arg7[%c0, %c0_1] : memref<8x1xf32, #tpu.memory_space<vmem>>, vector<8x1xf32>
    %c0_2 = arith.constant 0 : index
    %c0_3 = arith.constant 0 : index
    %4 = vector.load %arg3[%c0_2, %c0_3] : memref<8x384xbf16, #tpu.memory_space<vmem>>, vector<8x384xbf16>
    %c0_4 = arith.constant 0 : index
    %c0_5 = arith.constant 0 : index
    %5 = vector.load %arg4[%c0_4, %c0_5] : memref<384x1xbf16, #tpu.memory_space<vmem>>, vector<384x1xbf16>
    %cst = arith.constant dense<0.000000e+00> : vector<8x1xf32>
    %6 = tpu.matmul %4, %5, %cst {dimension_numbers = #tpu.dot_dimension_numbers<[1], [0], [0], [1], [0, 0, 1, 1], [], []>} : vector<8x384xbf16>, vector<384x1xbf16>, vector<8x1xf32> -> vector<8x1xf32>
    %7 = arith.addf %3, %6 : vector<8x1xf32>
    %c0_6 = arith.constant 0 : index
    %c0_7 = arith.constant 0 : index
    %8 = vector.load %arg7[%c0_6, %c0_7] : memref<8x1xf32, #tpu.memory_space<vmem>>, vector<8x1xf32>
    tpu.vector_store %arg7[%c0_6, %c0_7], %7 {strides = array<i32>} : memref<8x1xf32, #tpu.memory_space<vmem>>, vector<8x1xf32>,
    %c0_i32_8 = arith.constant 0 : i32
    %9 = arith.cmpi eq, %arg2, %c0_i32_8 : i32
    %10 = arith.extui %9 : i1 to i32
    %c0_i32_9 = arith.constant 0 : i32
    %11 = arith.cmpi ne, %10, %c0_i32_9 : i32
    scf.if %11 {
      %c0_10 = arith.constant 0 : index
      %c0_11 = arith.constant 0 : index
      %12 = vector.load %arg7[%c0_10, %c0_11] : memref<8x1xf32, #tpu.memory_space<vmem>>, vector<8x1xf32>
      %c0_12 = arith.constant 0 : index
      %c0_13 = arith.constant 0 : index
      %13 = vector.load %arg5[%c0_12, %c0_13] : memref<1x1xf32, #tpu.memory_space<vmem>>, vector<1x1xf32>
      %14 = vector.broadcast %13 : vector<1x1xf32> to vector<8x1xf32>
      %15 = arith.addf %12, %14 : vector<8x1xf32>
      %c0_14 = arith.constant 0 : index
      %c0_15 = arith.constant 0 : index
      %16 = vector.load %arg6[%c0_14, %c0_15] : memref<8x1xf32, #tpu.memory_space<vmem>>, vector<8x1xf32>
      tpu.vector_store %arg6[%c0_14, %c0_15], %15 {strides = array<i32>} : memref<8x1xf32, #tpu.memory_space<vmem>>, vector<8x1xf32>,
    } else {
    }
    return
  }
  func.func @transform_0(%arg0: i32, %arg1: i32, %arg2: i32) -> (i32, i32) {
    %c0_i32 = arith.constant 0 : i32
    return %arg0, %arg2 : i32, i32
  }
  func.func @transform_1(%arg0: i32, %arg1: i32, %arg2: i32) -> (i32, i32) {
    %c0_i32 = arith.constant 0 : i32
    return %arg2, %arg1 : i32, i32
  }
  func.func @transform_2(%arg0: i32, %arg1: i32, %arg2: i32) -> (i32, i32) {
    %c0_i32 = arith.constant 0 : i32
    %c0_i32_0 = arith.constant 0 : i32
    return %c0_i32, %arg1 : i32, i32
  }
  func.func @transform_3(%arg0: i32, %arg1: i32, %arg2: i32) -> (i32, i32) {
    %c0_i32 = arith.constant 0 : i32
    return %arg0, %arg1 : i32, i32
  }
}

</mosaic_0001>

<bundles_post_ra>
// kernel: forward.6
= control target key start
LH: loop header
LB: loop body
LE: loop exit
PB: predicated region body
PF: predicated region fallthrough
CT: control target
= control target key end

     0   :  { %vm18_vm0 = vcmask 64512   ;;  %v491_v6 = vmov 0.0   ;;  %vm364_vm3 = vcmask 60416   ;;  %s677_s1 = inlined_call_operand.vmem [shape: bf16[128,8], index: 1, kind: input, shape index: {}]   ;;  %s678_s2 = inlined_call_operand.vmem [shape: f32[1,8], index: 2, kind: input, shape index: {}]   ;;  %s679_s0 = inlined_call_operand.vmem [shape: bf16[128,128], index: 0, kind: input, shape index: {}]   ;;  %s680_s3 = inlined_call_operand.vmem [shape: bf16[128,8], index: 3, kind: output, shape index: {}]  }
   0x1   :  { %v464_v0 = vld [vmem:[%s677_s1 + $0x38] sm:$0xff]  ;;  %v463_v1 = vld [vmem:[%s677_s1 + $0x30] sm:$0xff]  ;;  %v462_v2 = vld [vmem:[%s677_s1 + $0x28] sm:$0xff]  ;;  %19 = vst.msk [vmem:[#allocation2] sm:$0xff] %vm18_vm0, %v491_v6 }
   0x2   :  { %179 = vmatpush.bf16.msra.mxu0 %v464_v0  ;;  %465 = vmatpush.bf16.msra.mxu1 %v464_v0  ;;  %v461_v3 = vld [vmem:[%s677_s1 + $0x20] sm:$0xff]  ;;  %v460_v4 = vld [vmem:[%s677_s1 + $0x18] sm:$0xff]  ;;  %v459_v5 = vld [vmem:[%s677_s1 + $0x10] sm:$0xff]  ;;  %20 = vst.msk [vmem:[#allocation2 + $0x8] sm:$0xff] %vm18_vm0, %v491_v6 }
   0x3   :  { %466 = vmatpush.bf16.msra.mxu2 %v464_v0  ;;  %467 = vmatpush.bf16.msra.mxu3 %v464_v0  ;;  %21 = vst.msk [vmem:[#allocation2 + $0x10] sm:$0xff] %vm18_vm0, %v491_v6  ;;  %v458_v7 = vld [vmem:[%s677_s1 + $0x8] sm:$0xff]  ;;  %v457_v8 = vld [vmem:[%s677_s1] sm:$0xff]  ;;  %v451_v10 = vld [vmem:[%s679_s0 + $0x10] sm:$0xff] }
   0x4   :  { %22 = vst.msk [vmem:[#allocation2 + $0x18] sm:$0xff] %vm18_vm0, %v491_v6  ;;  %v449_v9 = vld [vmem:[%s679_s0] sm:$0xff]  ;;  %v455_v12 = vld [vmem:[%s679_s0 + $0x30] sm:$0xff]  ;;  %v450_v13 = vld [vmem:[%s679_s0 + $0x8] sm:$0xff] }
   0x5   :  { %23 = vst.msk [vmem:[#allocation2 + $0x20] sm:$0xff] %vm18_vm0, %v491_v6  ;;  %v453_v11 = vld [vmem:[%s679_s0 + $0x20] sm:$0xff]  ;;  %v452_v14 = vld [vmem:[%s679_s0 + $0x18] sm:$0xff]  ;;  %v454_v15 = vld [vmem:[%s679_s0 + $0x28] sm:$0xff] }
   0x6   :  { %180 = vmatpush.bf16.msra.mxu0 %v463_v1  ;;  %468 = vmatpush.bf16.msra.mxu1 %v463_v1  ;;  %24 = vst.msk [vmem:[#allocation2 + $0x28] sm:$0xff] %vm18_vm0, %v491_v6  ;;  %v456_v16 = vld [vmem:[%s679_s0 + $0x38] sm:$0xff]  ;;  %v581_v27 = vld [vmem:[%s678_s2] ss:$0 sm:$0xff] }
   0x7   :  { %469 = vmatpush.bf16.msra.mxu2 %v463_v1  ;;  %470 = vmatpush.bf16.msra.mxu3 %v463_v1  ;;  %25 = vst.msk [vmem:[#allocation2 + $0x30] sm:$0xff] %vm18_vm0, %v491_v6 }
   0x8   :  { %26 = vst.msk [vmem:[#allocation2 + $0x38] sm:$0xff] %vm18_vm0, %v491_v6  ;;  %v35_v17 = vld [vmem:[#allocation2] sm:$0xff] }
   0x9   :  { %27 = vst.msk [vmem:[#allocation2 + $0x40] sm:$0xff] %vm18_vm0, %v491_v6  ;;  %v36_v25 = vld [vmem:[#allocation2 + $0x8] sm:$0xff] }
   0xa   :  { %181 = vmatpush.bf16.msra.mxu0 %v462_v2  ;;  %471 = vmatpush.bf16.msra.mxu1 %v462_v2  ;;  %28 = vst.msk [vmem:[#allocation2 + $0x48] sm:$0xff] %vm18_vm0, %v491_v6  ;;  %v37_v47 = vld [vmem:[#allocation2 + $0x10] sm:$0xff] }
   0xb   :  { %472 = vmatpush.bf16.msra.mxu2 %v462_v2  ;;  %473 = vmatpush.bf16.msra.mxu3 %v462_v2  ;;  %29 = vst.msk [vmem:[#allocation2 + $0x50] sm:$0xff] %vm18_vm0, %v491_v6 }
   0xc   :  { %30 = vst.msk [vmem:[#allocation2 + $0x58] sm:$0xff] %vm18_vm0, %v491_v6  ;;  %v39_v18 = vld [vmem:[#allocation2 + $0x20] sm:$0xff] }
   0xd   :  { %31 = vst.msk [vmem:[#allocation2 + $0x60] sm:$0xff] %vm18_vm0, %v491_v6  ;;  %v40_v26 = vld [vmem:[#allocation2 + $0x28] sm:$0xff] }
   0xe   :  { %182 = vmatpush.bf16.msra.mxu0 %v461_v3  ;;  %474 = vmatpush.bf16.msra.mxu1 %v461_v3  ;;  %32 = vst.msk [vmem:[#allocation2 + $0x68] sm:$0xff] %vm18_vm0, %v491_v6  ;;  %v41_v52 = vld [vmem:[#allocation2 + $0x30] sm:$0xff] }
   0xf   :  { %475 = vmatpush.bf16.msra.mxu2 %v461_v3  ;;  %476 = vmatpush.bf16.msra.mxu3 %v461_v3  ;;  %33 = vst.msk [vmem:[#allocation2 + $0x70] sm:$0xff] %vm18_vm0, %v491_v6 }
  0x10   :  { %34 = vst.msk [vmem:[#allocation2 + $0x78] sm:$0xff] %vm18_vm0, %v491_v6  ;;  %v43_v23 = vld [vmem:[#allocation2 + $0x40] sm:$0xff] }
  0x11   :  { %v44_v41 = vld [vmem:[#allocation2 + $0x48] sm:$0xff] }
  0x12   :  { %183 = vmatpush.bf16.msra.mxu0 %v460_v4  ;;  %477 = vmatpush.bf16.msra.mxu1 %v460_v4  ;;  %v45_v6 = vld [vmem:[#allocation2 + $0x50] sm:$0xff] }
  0x13   :  { %478 = vmatpush.bf16.msra.mxu2 %v460_v4  ;;  %479 = vmatpush.bf16.msra.mxu3 %v460_v4 }
  0x14   :  { %v47_v24 = vld [vmem:[#allocation2 + $0x60] sm:$0xff] }
  0x15   :  { %v48_v43 = vld [vmem:[#allocation2 + $0x68] sm:$0xff] }
  0x16   :  { %184 = vmatpush.bf16.msra.mxu0 %v459_v5  ;;  %480 = vmatpush.bf16.msra.mxu1 %v459_v5 }
  0x17   :  { %481 = vmatpush.bf16.msra.mxu2 %v459_v5  ;;  %482 = vmatpush.bf16.msra.mxu3 %v459_v5 }
  0x1a   :  { %185 = vmatpush.bf16.msra.mxu0 %v458_v7  ;;  %483 = vmatpush.bf16.msra.mxu1 %v458_v7 }
  0x1b   :  { %484 = vmatpush.bf16.msra.mxu2 %v458_v7  ;;  %485 = vmatpush.bf16.msra.mxu3 %v458_v7 }
  0x1e   :  { %186 = vmatpush.bf16.msra.mxu0 %v457_v8  ;;  %486 = vmatpush.bf16.msra.mxu1 %v457_v8 }
  0x1f   :  { %487 = vmatpush.bf16.msra.mxu2 %v457_v8  ;;  %488 = vmatpush.bf16.msra.mxu3 %v457_v8 }
  0x21   :  { %187 = vmatmul.bf16.vlgmr.msra.gmra.mxu0 %v449_v9  ;;  %197 = vmatmul.bf16.vlgmr.msra.gmra.mxu1 %v451_v10 }
  0x22   :  { %207 = vmatmul.bf16.vlgmr.msra.gmra.mxu2 %v453_v11  ;;  %217 = vmatmul.bf16.vlgmr.msra.gmra.mxu3 %v455_v12  ;;  %v49_v11 = vld [vmem:[#allocation2 + $0x70] sm:$0xff] }
  0x31   :  { %192 = vmatmul.bf16.gmra.mxu0 %v450_v13  ;;  %202 = vmatmul.bf16.gmra.mxu1 %v452_v14 }
  0x32   :  { %212 = vmatmul.bf16.gmra.mxu2 %v454_v15  ;;  %222 = vmatmul.bf16.gmra.mxu3 %v456_v16  ;;  %v38_v15 = vld [vmem:[#allocation2 + $0x18] sm:$0xff] }
  0x9e   :  { %v188_v19 = vpop.f32.mrf.mxu0  ;;  %v198_v20 = vpop.f32.mrf.mxu1 }
  0x9f   :  { %v228_v21 = vadd.f32 %v188_v19, %v35_v17  ;;  %v232_v22 = vadd.f32 %v198_v20, %v39_v18  ;;  %v42_v20 = vld [vmem:[#allocation2 + $0x38] sm:$0xff] }
  0xa1   :  { %245 = vst.msk [vmem:[#allocation2] sm:$0xff] %vm18_vm0, %v228_v21 }
  0xa2   :  { %249 = vst.msk [vmem:[#allocation2 + $0x20] sm:$0xff] %vm18_vm0, %v232_v22 }
  0xa5   :  { %v208_v28 = vpop.f32.mrf.mxu2  ;;  %v218_v29 = vpop.f32.mrf.mxu3 }
  0xa6   :  { %v236_v30 = vadd.f32 %v208_v28, %v43_v23  ;;  %v240_v31 = vadd.f32 %v218_v29, %v47_v24  ;;  %v190_v32 = vpop.f32.mrf.mxu0  ;;  %v200_v33 = vpop.f32.mrf.mxu1 }
  0xa7   :  { %v229_v34 = vadd.f32 %v190_v32, %v36_v25  ;;  %v233_v35 = vadd.f32 %v200_v33, %v40_v26  ;;  %v46_v32 = vld [vmem:[#allocation2 + $0x58] sm:$0xff] }
  0xa8   :  { %v264_v36 = vld [vmem:[#allocation2] sm:$0xff]  ;;  %253 = vst.msk [vmem:[#allocation2 + $0x40] sm:$0xff] %vm18_vm0, %v236_v30 }
  0xa9   :  { %v284_v37 = vadd.f32 %v581_v27, %v264_v36  ;;  %v268_v38 = vld [vmem:[#allocation2 + $0x20] sm:$0xff]  ;;  %257 = vst.msk [vmem:[#allocation2 + $0x60] sm:$0xff] %vm18_vm0, %v240_v31 }
  0xaa   :  { %v288_v39 = vadd.f32 %v581_v27, %v268_v38  ;;  %246 = vst.msk [vmem:[#allocation2 + $0x8] sm:$0xff] %vm18_vm0, %v229_v34 }
  0xab   :  { %vm300_vm1 = vcmp.gt.f32.partialorder %v284_v37, 0.0  ;;  %v316_v40 = vmul.f32 0.2, %v284_v37  ;;  %250 = vst.msk [vmem:[#allocation2 + $0x28] sm:$0xff] %vm18_vm0, %v233_v35 }
  0xac   :  { %vm304_vm2 = vcmp.gt.f32.partialorder %v288_v39, 0.0  ;;  %v320_v42 = vmul.f32 0.2, %v288_v39 }
  0xad   :  { %v332_v44 = vsel %vm300_vm1, %v284_v37, %v316_v40  ;;  %v210_v45 = vpop.f32.mrf.mxu2  ;;  %v220_v46 = vpop.f32.mrf.mxu3 }
  0xae   :  { %v348_v48 = vpack.c.bf16 %v332_v44, %v332_v44  ;;  %v336_v49 = vsel %vm304_vm2, %v288_v39, %v320_v42  ;;  %v237_v50 = vadd.f32 %v210_v45, %v44_v41  ;;  %v193_v51 = vpop.f32.mrf.mxu0  ;;  %v203_v53 = vpop.f32.mrf.mxu1  ;;  %v241_v56 = vadd.f32 %v220_v46, %v48_v43  ;;  %v50_v42 = vld [vmem:[#allocation2 + $0x78] sm:$0xff] }
  0xaf   :  { %v352_v54 = vpack.c.bf16 %v336_v49, %v336_v49  ;;  %v272_v55 = vld [vmem:[#allocation2 + $0x40] sm:$0xff]  ;;  %v230_v59 = vadd.f32 %v193_v51, %v37_v47  ;;  %v234_v62 = vadd.f32 %v203_v53, %v41_v52 }
  0xb0   :  { %365 = vst.msk [vmem:[%s680_s3] sm:$0xf] %vm364_vm3, %v348_v48  ;;  %v292_v57 = vadd.f32 %v581_v27, %v272_v55  ;;  %v276_v58 = vld [vmem:[#allocation2 + $0x60] sm:$0xff] }
  0xb1   :  { %369 = vst.msk [vmem:[%s680_s3 + $0x10] sm:$0xf] %vm364_vm3, %v352_v54  ;;  %v296_v60 = vadd.f32 %v581_v27, %v276_v58  ;;  %v265_v61 = vld [vmem:[#allocation2 + $0x8] sm:$0xff] }
  0xb2   :  { %vm308_vm4 = vcmp.gt.f32.partialorder %v292_v57, 0.0  ;;  %v324_v63 = vmul.f32 0.2, %v292_v57  ;;  %v285_v0 = vadd.f32 %v581_v27, %v265_v61  ;;  %v269_v1 = vld [vmem:[#allocation2 + $0x28] sm:$0xff]  ;;  %254 = vst.msk [vmem:[#allocation2 + $0x48] sm:$0xff] %vm18_vm0, %v237_v50 }
  0xb3   :  { %vm312_vm5 = vcmp.gt.f32.partialorder %v296_v60, 0.0  ;;  %v328_v2 = vmul.f32 0.2, %v296_v60  ;;  %v289_v3 = vadd.f32 %v581_v27, %v269_v1  ;;  %258 = vst.msk [vmem:[#allocation2 + $0x68] sm:$0xff] %vm18_vm0, %v241_v56 }
  0xb4   :  { %v340_v4 = vsel %vm308_vm4, %v292_v57, %v324_v63  ;;  %vm301_vm6 = vcmp.gt.f32.partialorder %v285_v0, 0.0  ;;  %v317_v5 = vmul.f32 0.2, %v285_v0  ;;  %247 = vst.msk [vmem:[#allocation2 + $0x10] sm:$0xff] %vm18_vm0, %v230_v59 }
  0xb5   :  { %v356_v7 = vpack.c.bf16 %v340_v4, %v340_v4  ;;  %v344_v8 = vsel %vm312_vm5, %v296_v60, %v328_v2  ;;  %vm305_vm7 = vcmp.gt.f32.partialorder %v289_v3, 0.0  ;;  %v321_v9 = vmul.f32 0.2, %v289_v3  ;;  %251 = vst.msk [vmem:[#allocation2 + $0x30] sm:$0xff] %vm18_vm0, %v234_v62  ;;  %v213_v10 = vpop.f32.mrf.mxu2  ;;  %v223_v12 = vpop.f32.mrf.mxu3 }
  0xb6   :  { %v360_v13 = vpack.c.bf16 %v344_v8, %v344_v8  ;;  %v333_v14 = vsel %vm301_vm6, %v285_v0, %v317_v5  ;;  %v195_v16 = vpop.f32.mrf.mxu0  ;;  %v238_v19 = vadd.f32 %v213_v10, %v45_v6  ;;  %v205_v21 = vpop.f32.mrf.mxu1  ;;  %v242_v23 = vadd.f32 %v223_v12, %v49_v11 }
  0xb7   :  { %373 = vst.msk [vmem:[%s680_s3 + $0x20] sm:$0xf] %vm364_vm3, %v356_v7  ;;  %v349_v17 = vpack.c.bf16 %v333_v14, %v333_v14  ;;  %v337_v18 = vsel %vm305_vm7, %v289_v3, %v321_v9  ;;  %v231_v25 = vadd.f32 %v195_v16, %v38_v15  ;;  %v235_v29 = vadd.f32 %v205_v21, %v42_v20 }
  0xb8   :  { %377 = vst.msk [vmem:[%s680_s3 + $0x30] sm:$0xf] %vm364_vm3, %v360_v13  ;;  %v353_v22 = vpack.c.bf16 %v337_v18, %v337_v18 }
  0xb9   :  { %366 = vst.msk [vmem:[%s680_s3 + $0x4] sm:$0xf] %vm364_vm3, %v349_v17  ;;  %v273_v24 = vld [vmem:[#allocation2 + $0x48] sm:$0xff] }
  0xba   :  { %370 = vst.msk [vmem:[%s680_s3 + $0x14] sm:$0xf] %vm364_vm3, %v353_v22  ;;  %v293_v26 = vadd.f32 %v581_v27, %v273_v24  ;;  %v277_v28 = vld [vmem:[#allocation2 + $0x68] sm:$0xff] }
  0xbb   :  { %v297_v30 = vadd.f32 %v581_v27, %v277_v28  ;;  %v266_v31 = vld [vmem:[#allocation2 + $0x10] sm:$0xff]  ;;  %255 = vst.msk [vmem:[#allocation2 + $0x50] sm:$0xff] %vm18_vm0, %v238_v19 }
  0xbc   :  { %vm309_vm8 = vcmp.gt.f32.partialorder %v293_v26, 0.0  ;;  %v325_v33 = vmul.f32 0.2, %v293_v26  ;;  %v286_v34 = vadd.f32 %v581_v27, %v266_v31  ;;  %v270_v35 = vld [vmem:[#allocation2 + $0x30] sm:$0xff]  ;;  %259 = vst.msk [vmem:[#allocation2 + $0x70] sm:$0xff] %vm18_vm0, %v242_v23 }
  0xbd   :  { %vm313_vm9 = vcmp.gt.f32.partialorder %v297_v30, 0.0  ;;  %v329_v36 = vmul.f32 0.2, %v297_v30  ;;  %v290_v37 = vadd.f32 %v581_v27, %v270_v35  ;;  %248 = vst.msk [vmem:[#allocation2 + $0x18] sm:$0xff] %vm18_vm0, %v231_v25  ;;  %v215_v38 = vpop.f32.mrf.mxu2  ;;  %v225_v43 = vpop.f32.mrf.mxu3 }
  0xbe   :  { %v341_v39 = vsel %vm309_vm8, %v293_v26, %v325_v33  ;;  %vm302_vm10 = vcmp.gt.f32.partialorder %v286_v34, 0.0  ;;  %v318_v40 = vmul.f32 0.2, %v286_v34  ;;  %252 = vst.msk [vmem:[#allocation2 + $0x38] sm:$0xff] %vm18_vm0, %v235_v29  ;;  %v239_v41 = vadd.f32 %v215_v38, %v46_v32 }
  0xbf   :  { %v357_v44 = vpack.c.bf16 %v341_v39, %v341_v39  ;;  %v345_v45 = vsel %vm313_vm9, %v297_v30, %v329_v36  ;;  %vm306_vm11 = vcmp.gt.f32.partialorder %v290_v37, 0.0  ;;  %v322_v46 = vmul.f32 0.2, %v290_v37 }
  0xc0   :  { %v361_v47 = vpack.c.bf16 %v345_v45, %v345_v45  ;;  %v334_v48 = vsel %vm302_vm10, %v286_v34, %v318_v40  ;;  %256 = vst.msk [vmem:[#allocation2 + $0x58] sm:$0xff] %vm18_vm0, %v239_v41  ;;  %v243_v51 = vadd.f32 %v225_v43, %v50_v42 }
  0xc1   :  { %374 = vst.msk [vmem:[%s680_s3 + $0x24] sm:$0xf] %vm364_vm3, %v357_v44  ;;  %v350_v49 = vpack.c.bf16 %v334_v48, %v334_v48  ;;  %v338_v50 = vsel %vm306_vm11, %v290_v37, %v322_v46 }
  0xc2   :  { %378 = vst.msk [vmem:[%s680_s3 + $0x34] sm:$0xf] %vm364_vm3, %v361_v47  ;;  %v354_v52 = vpack.c.bf16 %v338_v50, %v338_v50  ;;  %v274_v53 = vld [vmem:[#allocation2 + $0x50] sm:$0xff] }
  0xc3   :  { %367 = vst.msk [vmem:[%s680_s3 + $0x8] sm:$0xf] %vm364_vm3, %v350_v49  ;;  %v294_v54 = vadd.f32 %v581_v27, %v274_v53  ;;  %v278_v55 = vld [vmem:[#allocation2 + $0x70] sm:$0xff] }
  0xc4   :  { %371 = vst.msk [vmem:[%s680_s3 + $0x18] sm:$0xf] %vm364_vm3, %v354_v52  ;;  %v298_v56 = vadd.f32 %v581_v27, %v278_v55  ;;  %v267_v57 = vld [vmem:[#allocation2 + $0x18] sm:$0xff] }
  0xc5   :  { %vm310_vm12 = vcmp.gt.f32.partialorder %v294_v54, 0.0  ;;  %v326_v58 = vmul.f32 0.2, %v294_v54  ;;  %v287_v59 = vadd.f32 %v581_v27, %v267_v57  ;;  %v271_v60 = vld [vmem:[#allocation2 + $0x38] sm:$0xff]  ;;  %260 = vst.msk [vmem:[#allocation2 + $0x78] sm:$0xff] %vm18_vm0, %v243_v51 }
  0xc6   :  { %vm314_vm13 = vcmp.gt.f32.partialorder %v298_v56, 0.0  ;;  %v330_v61 = vmul.f32 0.2, %v298_v56  ;;  %v291_v62 = vadd.f32 %v581_v27, %v271_v60 }
  0xc7   :  { %v342_v63 = vsel %vm310_vm12, %v294_v54, %v326_v58  ;;  %vm303_vm14 = vcmp.gt.f32.partialorder %v287_v59, 0.0  ;;  %v319_v0 = vmul.f32 0.2, %v287_v59  ;;  %v275_v1 = vld [vmem:[#allocation2 + $0x58] sm:$0xff] }
  0xc8   :  { %v358_v2 = vpack.c.bf16 %v342_v63, %v342_v63  ;;  %v346_v3 = vsel %vm314_vm13, %v298_v56, %v330_v61  ;;  %vm307_vm15 = vcmp.gt.f32.partialorder %v291_v62, 0.0  ;;  %v323_v4 = vmul.f32 0.2, %v291_v62 }
  0xc9   :  { %v362_v5 = vpack.c.bf16 %v346_v3, %v346_v3  ;;  %v335_v6 = vsel %vm303_vm14, %v287_v59, %v319_v0  ;;  %v295_v7 = vadd.f32 %v581_v27, %v275_v1 }
  0xca   :  { %375 = vst.msk [vmem:[%s680_s3 + $0x28] sm:$0xf] %vm364_vm3, %v358_v2  ;;  %v351_v8 = vpack.c.bf16 %v335_v6, %v335_v6  ;;  %v339_v9 = vsel %vm307_vm15, %v291_v62, %v323_v4 }
  0xcb   :  { %379 = vst.msk [vmem:[%s680_s3 + $0x38] sm:$0xf] %vm364_vm3, %v362_v5  ;;  %v355_v10 = vpack.c.bf16 %v339_v9, %v339_v9  ;;  %vm311_vm0 = vcmp.gt.f32.partialorder %v295_v7, 0.0  ;;  %v327_v11 = vmul.f32 0.2, %v295_v7 }
  0xcc   :  { %368 = vst.msk [vmem:[%s680_s3 + $0xc] sm:$0xf] %vm364_vm3, %v351_v8  ;;  %v279_v12 = vld [vmem:[#allocation2 + $0x78] sm:$0xff] }
  0xcd   :  { %372 = vst.msk [vmem:[%s680_s3 + $0x1c] sm:$0xf] %vm364_vm3, %v355_v10  ;;  %v343_v13 = vsel %vm311_vm0, %v295_v7, %v327_v11  ;;  %v299_v14 = vadd.f32 %v581_v27, %v279_v12 }
  0xce   :  { %v359_v15 = vpack.c.bf16 %v343_v13, %v343_v13 }
  0xcf   :  { %vm315_vm1 = vcmp.gt.f32.partialorder %v299_v14, 0.0  ;;  %v331_v16 = vmul.f32 0.2, %v299_v14 }
  0xd0   :  { %376 = vst.msk [vmem:[%s680_s3 + $0x2c] sm:$0xf] %vm364_vm3, %v359_v15 }
  0xd1   :  { %v347_v17 = vsel %vm315_vm1, %v299_v14, %v331_v16 }
  0xd2   :  { %v363_v18 = vpack.c.bf16 %v347_v17, %v347_v17 }
  0xd4   :  { %380 = vst.msk [vmem:[%s680_s3 + $0x3c] sm:$0xf] %vm364_vm3, %v363_v18 }

// kernel: forward.7
= control target key start
LH: loop header
LB: loop body
LE: loop exit
PB: predicated region body
PF: predicated region fallthrough
CT: control target
= control target key end

     0   :  { %vm18_vm0 = vcmask 130048   ;;  %v384_v28 = vmov 0.0   ;;  %vm257_vm2 = vcmask 125952   ;;  %s504_s1 = inlined_call_operand.vmem [shape: bf16[256,16], index: 1, kind: input, shape index: {}]   ;;  %s505_s0 = inlined_call_operand.vmem [shape: bf16[32,256], index: 0, kind: input, shape index: {}]   ;;  %s506_s2 = inlined_call_operand.vmem [shape: f32[1,16], index: 2, kind: input, shape index: {}]   ;;  %s507_s3 = inlined_call_operand.vmem [shape: bf16[32,16], index: 3, kind: output, shape index: {}]  }
   0x1   :  { %v357_v0 = vld [vmem:[%s504_s1 + $0x38] sm:$0xff]  ;;  %v356_v2 = vld [vmem:[%s504_s1 + $0x30] sm:$0xff]  ;;  %v355_v4 = vld [vmem:[%s504_s1 + $0x28] sm:$0xff]  ;;  %19 = vst.msk [vmem:[#allocation2] sm:$0xff] %vm18_vm0, %v384_v28 }
   0x2   :  { %v365_v1 = vld [vmem:[%s504_s1 + $0x78] sm:$0xff]  ;;  %179 = vmatpush.bf16.msra.mxu0 %v357_v0  ;;  %366 = vmatpush.bf16.msra.mxu2 %v357_v0  ;;  %v364_v3 = vld [vmem:[%s504_s1 + $0x70] sm:$0xff]  ;;  %v363_v5 = vld [vmem:[%s504_s1 + $0x68] sm:$0xff]  ;;  %20 = vst.msk [vmem:[#allocation2 + $0x8] sm:$0xff] %vm18_vm0, %v384_v28 }
   0x3   :  { %198 = vmatpush.bf16.msra.mxu1 %v365_v1  ;;  %374 = vmatpush.bf16.msra.mxu3 %v365_v1  ;;  %v354_v6 = vld [vmem:[%s504_s1 + $0x20] sm:$0xff]  ;;  %v353_v8 = vld [vmem:[%s504_s1 + $0x18] sm:$0xff]  ;;  %v352_v10 = vld [vmem:[%s504_s1 + $0x10] sm:$0xff]  ;;  %21 = vst.msk [vmem:[#allocation2 + $0x10] sm:$0xff] %vm18_vm0, %v384_v28 }
   0x4   :  { %v362_v7 = vld [vmem:[%s504_s1 + $0x60] sm:$0xff]  ;;  %v361_v9 = vld [vmem:[%s504_s1 + $0x58] sm:$0xff]  ;;  %v360_v11 = vld [vmem:[%s504_s1 + $0x50] sm:$0xff]  ;;  %22 = vst.msk [vmem:[#allocation2 + $0x18] sm:$0xff] %vm18_vm0, %v384_v28 }
   0x5   :  { %v351_v12 = vld [vmem:[%s504_s1 + $0x8] sm:$0xff]  ;;  %v350_v14 = vld [vmem:[%s504_s1] sm:$0xff]  ;;  %v276_v18 = vld [vmem:[%s505_s0 + $0x10] sm:$0xf] }
   0x6   :  { %180 = vmatpush.bf16.msra.mxu0 %v356_v2  ;;  %367 = vmatpush.bf16.msra.mxu2 %v356_v2  ;;  %v359_v13 = vld [vmem:[%s504_s1 + $0x48] sm:$0xff]  ;;  %v358_v15 = vld [vmem:[%s504_s1 + $0x40] sm:$0xff]  ;;  %v349_v19 = vld [vmem:[%s505_s0 + $0x14] sm:$0xf0] }
   0x7   :  { %199 = vmatpush.bf16.msra.mxu1 %v364_v3  ;;  %375 = vmatpush.bf16.msra.mxu3 %v364_v3  ;;  %v268_v16 = vld [vmem:[%s505_s0] sm:$0xf]  ;;  %v347_v17 = vld [vmem:[%s505_s0 + $0x4] sm:$0xf0]  ;;  %v346_v20 = vld [vmem:[%s505_s0 + $0x4] sm:$0xf]  ;;  %v277_v25 = vor.u32 %v349_v19, %v276_v18 }
   0x8   :  { %v270_v21 = vld [vmem:[%s505_s0 + $0x8] sm:$0xf0]  ;;  %v348_v22 = vld [vmem:[%s505_s0 + $0x14] sm:$0xf]  ;;  %v278_v23 = vld [vmem:[%s505_s0 + $0x18] sm:$0xf0]  ;;  %v269_v24 = vor.u32 %v347_v17, %v268_v16 }
   0x9   :  { %v273_v26 = vor.u32 %v346_v20, %v270_v21  ;;  %v281_v27 = vor.u32 %v348_v22, %v278_v23  ;;  %v23_v30 = vld [vmem:[#allocation2] sm:$0xff]  ;;  %v24_v39 = vld [vmem:[#allocation2 + $0x8] sm:$0xff] }
   0xa   :  { %181 = vmatpush.bf16.msra.mxu0 %v355_v4  ;;  %368 = vmatpush.bf16.msra.mxu2 %v355_v4  ;;  %v25_v35 = vld [vmem:[#allocation2 + $0x10] sm:$0xff]  ;;  %v383_v41 = vld [vmem:[%s506_s2] ss:$0 sm:$0xff] }
   0xb   :  { %200 = vmatpush.bf16.msra.mxu1 %v363_v5  ;;  %376 = vmatpush.bf16.msra.mxu3 %v363_v5  ;;  %v26_v48 = vld [vmem:[#allocation2 + $0x18] sm:$0xff] }
   0xe   :  { %182 = vmatpush.bf16.msra.mxu0 %v354_v6  ;;  %369 = vmatpush.bf16.msra.mxu2 %v354_v6 }
   0xf   :  { %201 = vmatpush.bf16.msra.mxu1 %v362_v7  ;;  %377 = vmatpush.bf16.msra.mxu3 %v362_v7 }
  0x12   :  { %183 = vmatpush.bf16.msra.mxu0 %v353_v8  ;;  %370 = vmatpush.bf16.msra.mxu2 %v353_v8 }
  0x13   :  { %202 = vmatpush.bf16.msra.mxu1 %v361_v9  ;;  %378 = vmatpush.bf16.msra.mxu3 %v361_v9 }
  0x16   :  { %184 = vmatpush.bf16.msra.mxu0 %v352_v10  ;;  %371 = vmatpush.bf16.msra.mxu2 %v352_v10 }
  0x17   :  { %203 = vmatpush.bf16.msra.mxu1 %v360_v11  ;;  %379 = vmatpush.bf16.msra.mxu3 %v360_v11 }
  0x1a   :  { %185 = vmatpush.bf16.msra.mxu0 %v351_v12  ;;  %372 = vmatpush.bf16.msra.mxu2 %v351_v12 }
  0x1b   :  { %204 = vmatpush.bf16.msra.mxu1 %v359_v13  ;;  %380 = vmatpush.bf16.msra.mxu3 %v359_v13 }
  0x1e   :  { %186 = vmatpush.bf16.msra.mxu0 %v350_v14  ;;  %373 = vmatpush.bf16.msra.mxu2 %v350_v14 }
  0x1f   :  { %205 = vmatpush.bf16.msra.mxu1 %v358_v15  ;;  %381 = vmatpush.bf16.msra.mxu3 %v358_v15 }
  0x21   :  { %187 = vmatmul.bf16.vlgmr.msra.gmra.mxu0 %v269_v24  ;;  %192 = vmatmul.bf16.vlgmr.msra.gmra.mxu2 %v277_v25 }
  0x22   :  { %206 = vmatmul.bf16.vlgmr.msra.gmra.mxu1 %v273_v26  ;;  %211 = vmatmul.bf16.vlgmr.msra.gmra.mxu3 %v281_v27 }
  0x9e   :  { %v188_v29 = vpop.f32.mrf.mxu0 }
  0x9f   :  { %v207_v31 = vpop.f32.mrf.mxu1 }
  0xa0   :  { %v208_v32 = vadd.f32 %v207_v31, %v188_v29 }
  0xa2   :  { %v217_v33 = vadd.f32 %v208_v32, %v23_v30 }
  0xa4   :  { %222 = vst.msk [vmem:[#allocation2] sm:$0xff] %vm18_vm0, %v217_v33  ;;  %v193_v34 = vpop.f32.mrf.mxu2 }
  0xa5   :  { %v212_v36 = vpop.f32.mrf.mxu3 }
  0xa6   :  { %v213_v37 = vadd.f32 %v212_v36, %v193_v34  ;;  %v190_v38 = vpop.f32.mrf.mxu0 }
  0xa7   :  { %v209_v40 = vpop.f32.mrf.mxu1 }
  0xa8   :  { %v219_v42 = vadd.f32 %v213_v37, %v25_v35  ;;  %v210_v43 = vadd.f32 %v209_v40, %v190_v38 }
  0xaa   :  { %224 = vst.msk [vmem:[#allocation2 + $0x10] sm:$0xff] %vm18_vm0, %v219_v42  ;;  %v218_v44 = vadd.f32 %v210_v43, %v24_v39 }
  0xab   :  { %v229_v45 = vld [vmem:[#allocation2] sm:$0xff] }
  0xac   :  { %v237_v46 = vadd.f32 %v383_v41, %v229_v45  ;;  %223 = vst.msk [vmem:[#allocation2 + $0x8] sm:$0xff] %vm18_vm0, %v218_v44  ;;  %v195_v47 = vpop.f32.mrf.mxu2 }
  0xad   :  { %v214_v49 = vpop.f32.mrf.mxu3 }
  0xae   :  { %vm241_vm1 = vcmp.gt.f32.partialorder %v237_v46, 0.0  ;;  %v245_v50 = vmul.f32 0.2, %v237_v46  ;;  %v215_v51 = vadd.f32 %v214_v49, %v195_v47 }
  0xb0   :  { %v249_v52 = vsel %vm241_vm1, %v237_v46, %v245_v50  ;;  %v220_v53 = vadd.f32 %v215_v51, %v26_v48 }
  0xb1   :  { %v253_v54 = vpack.c.bf16 %v249_v52, %v249_v52  ;;  %v231_v55 = vld [vmem:[#allocation2 + $0x10] sm:$0xff] }
  0xb2   :  { %v239_v56 = vadd.f32 %v383_v41, %v231_v55  ;;  %225 = vst.msk [vmem:[#allocation2 + $0x18] sm:$0xff] %vm18_vm0, %v220_v53 }
  0xb3   :  { %258 = vst.msk [vmem:[%s507_s3] sm:$0xf] %vm257_vm2, %v253_v54  ;;  %v230_v57 = vld [vmem:[#allocation2 + $0x8] sm:$0xff] }
  0xb4   :  { %vm243_vm3 = vcmp.gt.f32.partialorder %v239_v56, 0.0  ;;  %v247_v58 = vmul.f32 0.2, %v239_v56  ;;  %v238_v59 = vadd.f32 %v383_v41, %v230_v57 }
  0xb6   :  { %v251_v60 = vsel %vm243_vm3, %v239_v56, %v247_v58  ;;  %vm242_vm4 = vcmp.gt.f32.partialorder %v238_v59, 0.0  ;;  %v246_v61 = vmul.f32 0.2, %v238_v59 }
  0xb7   :  { %v255_v62 = vpack.c.bf16 %v251_v60, %v251_v60 }
  0xb8   :  { %v250_v63 = vsel %vm242_vm4, %v238_v59, %v246_v61 }
  0xb9   :  { %260 = vst.msk [vmem:[%s507_s3 + $0x8] sm:$0xf] %vm257_vm2, %v255_v62  ;;  %v254_v0 = vpack.c.bf16 %v250_v63, %v250_v63  ;;  %v232_v1 = vld [vmem:[#allocation2 + $0x18] sm:$0xff] }
  0xba   :  { %v240_v2 = vadd.f32 %v383_v41, %v232_v1 }
  0xbb   :  { %259 = vst.msk [vmem:[%s507_s3 + $0x4] sm:$0xf] %vm257_vm2, %v254_v0 }
  0xbc   :  { %vm244_vm5 = vcmp.gt.f32.partialorder %v240_v2, 0.0  ;;  %v248_v3 = vmul.f32 0.2, %v240_v2 }
  0xbe   :  { %v252_v4 = vsel %vm244_vm5, %v240_v2, %v248_v3 }
  0xbf   :  { %v256_v5 = vpack.c.bf16 %v252_v4, %v252_v4 }
  0xc1   :  { %261 = vst.msk [vmem:[%s507_s3 + $0xc] sm:$0xf] %vm257_vm2, %v256_v5 }

// kernel: forward.8
= control target key start
LH: loop header
LB: loop body
LE: loop exit
PB: predicated region body
PF: predicated region fallthrough
CT: control target
= control target key end

     0   :  { %vm18_vm0 = vcmask 261120   ;;  %v529_v42 = vmov 0.0   ;;  %vm361_vm2 = vcmask 257024   ;;  %s658_s1 = inlined_call_operand.vmem [shape: bf16[512,32], index: 1, kind: input, shape index: {}]   ;;  %s659_s0 = inlined_call_operand.vmem [shape: bf16[8,512], index: 0, kind: input, shape index: {}]   ;;  %s660_s2 = inlined_call_operand.vmem [shape: f32[1,32], index: 2, kind: input, shape index: {}]   ;;  %s661_s3 = inlined_call_operand.vmem [shape: bf16[8,32], index: 3, kind: output, shape index: {}]  }
   0x1   :  { %v502_v0 = vld [vmem:[%s658_s1 + $0x38] sm:$0xff]  ;;  %v501_v4 = vld [vmem:[%s658_s1 + $0x30] sm:$0xff]  ;;  %v500_v8 = vld [vmem:[%s658_s1 + $0x28] sm:$0xff]  ;;  %19 = vst.msk [vmem:[#allocation2] sm:$0xff] %vm18_vm0, %v529_v42 }
   0x2   :  { %v510_v1 = vld [vmem:[%s658_s1 + $0x78] sm:$0xff]  ;;  %293 = vmatpush.bf16.msra.mxu0 %v502_v0  ;;  %v509_v5 = vld [vmem:[%s658_s1 + $0x70] sm:$0xff]  ;;  %v508_v9 = vld [vmem:[%s658_s1 + $0x68] sm:$0xff] }
   0x3   :  { %v518_v2 = vld [vmem:[%s658_s1 + $0xb8] sm:$0xff]  ;;  %306 = vmatpush.bf16.msra.mxu1 %v510_v1  ;;  %v517_v6 = vld [vmem:[%s658_s1 + $0xb0] sm:$0xff]  ;;  %v516_v10 = vld [vmem:[%s658_s1 + $0xa8] sm:$0xff] }
   0x4   :  { %v526_v3 = vld [vmem:[%s658_s1 + $0xf8] sm:$0xff]  ;;  %319 = vmatpush.bf16.msra.mxu2 %v518_v2  ;;  %v525_v7 = vld [vmem:[%s658_s1 + $0xf0] sm:$0xff]  ;;  %v524_v11 = vld [vmem:[%s658_s1 + $0xe8] sm:$0xff] }
   0x5   :  { %332 = vmatpush.bf16.msra.mxu3 %v526_v3  ;;  %v499_v12 = vld [vmem:[%s658_s1 + $0x20] sm:$0xff]  ;;  %v498_v16 = vld [vmem:[%s658_s1 + $0x18] sm:$0xff]  ;;  %v497_v20 = vld [vmem:[%s658_s1 + $0x10] sm:$0xff] }
   0x6   :  { %294 = vmatpush.bf16.msra.mxu0 %v501_v4  ;;  %v507_v13 = vld [vmem:[%s658_s1 + $0x60] sm:$0xff]  ;;  %v506_v17 = vld [vmem:[%s658_s1 + $0x58] sm:$0xff]  ;;  %v505_v21 = vld [vmem:[%s658_s1 + $0x50] sm:$0xff] }
   0x7   :  { %307 = vmatpush.bf16.msra.mxu1 %v509_v5  ;;  %v515_v14 = vld [vmem:[%s658_s1 + $0xa0] sm:$0xff]  ;;  %v514_v18 = vld [vmem:[%s658_s1 + $0x98] sm:$0xff]  ;;  %v513_v22 = vld [vmem:[%s658_s1 + $0x90] sm:$0xff] }
   0x8   :  { %320 = vmatpush.bf16.msra.mxu2 %v517_v6  ;;  %v523_v15 = vld [vmem:[%s658_s1 + $0xe0] sm:$0xff]  ;;  %v522_v19 = vld [vmem:[%s658_s1 + $0xd8] sm:$0xff]  ;;  %v521_v23 = vld [vmem:[%s658_s1 + $0xd0] sm:$0xff] }
   0x9   :  { %333 = vmatpush.bf16.msra.mxu3 %v525_v7  ;;  %v496_v24 = vld [vmem:[%s658_s1 + $0x8] sm:$0xff]  ;;  %v21_v26 = vld [vmem:[%s659_s0] sm:$0xff] }
   0xa   :  { %295 = vmatpush.bf16.msra.mxu0 %v500_v8  ;;  %v504_v25 = vld [vmem:[%s658_s1 + $0x48] sm:$0xff]  ;;  %v89_v30 = vunpack.c.l.b16 %v21_v26  ;;  %v90_v31 = vunpack.c.h.b16 %v21_v26  ;;  %v495_v32 = vld [vmem:[%s658_s1] sm:$0xff] }
   0xb   :  { %308 = vmatpush.bf16.msra.mxu1 %v508_v9  ;;  %v512_v27 = vld [vmem:[%s658_s1 + $0x88] sm:$0xff]  ;;  %v503_v33 = vld [vmem:[%s658_s1 + $0x40] sm:$0xff] }
   0xc   :  { %321 = vmatpush.bf16.msra.mxu2 %v516_v10  ;;  %v520_v28 = vld [vmem:[%s658_s1 + $0xc8] sm:$0xff]  ;;  %v511_v36 = vld [vmem:[%s658_s1 + $0x80] sm:$0xff]  ;;  %v93_v38 = vpack.c.b16 %v89_v30, %v89_v30  ;;  %v94_v39 = vpack.c.b16 %v90_v31, %v90_v31 }
   0xd   :  { %334 = vmatpush.bf16.msra.mxu3 %v524_v11  ;;  %v22_v29 = vld [vmem:[%s659_s0 + $0x8] sm:$0xff]  ;;  %v519_v37 = vld [vmem:[%s658_s1 + $0xc0] sm:$0xff] }
   0xe   :  { %296 = vmatpush.bf16.msra.mxu0 %v499_v12  ;;  %v91_v34 = vunpack.c.l.b16 %v22_v29  ;;  %v92_v35 = vunpack.c.h.b16 %v22_v29  ;;  %v20_v51 = vld [vmem:[#allocation2] sm:$0xff] }
   0xf   :  { %309 = vmatpush.bf16.msra.mxu1 %v507_v13  ;;  %v528_v56 = vld [vmem:[%s660_s2] ss:$0 sm:$0xff] }
  0x10   :  { %322 = vmatpush.bf16.msra.mxu2 %v515_v14  ;;  %v95_v40 = vpack.c.b16 %v91_v34, %v91_v34  ;;  %v96_v41 = vpack.c.b16 %v92_v35, %v92_v35 }
  0x11   :  { %335 = vmatpush.bf16.msra.mxu3 %v523_v15 }
  0x12   :  { %297 = vmatpush.bf16.msra.mxu0 %v498_v16 }
  0x13   :  { %310 = vmatpush.bf16.msra.mxu1 %v506_v17 }
  0x14   :  { %323 = vmatpush.bf16.msra.mxu2 %v514_v18 }
  0x15   :  { %336 = vmatpush.bf16.msra.mxu3 %v522_v19 }
  0x16   :  { %298 = vmatpush.bf16.msra.mxu0 %v497_v20 }
  0x17   :  { %311 = vmatpush.bf16.msra.mxu1 %v505_v21 }
  0x18   :  { %324 = vmatpush.bf16.msra.mxu2 %v513_v22 }
  0x19   :  { %337 = vmatpush.bf16.msra.mxu3 %v521_v23 }
  0x1a   :  { %299 = vmatpush.bf16.msra.mxu0 %v496_v24 }
  0x1b   :  { %312 = vmatpush.bf16.msra.mxu1 %v504_v25 }
  0x1c   :  { %325 = vmatpush.bf16.msra.mxu2 %v512_v27 }
  0x1d   :  { %338 = vmatpush.bf16.msra.mxu3 %v520_v28 }
  0x1e   :  { %300 = vmatpush.bf16.msra.mxu0 %v495_v32 }
  0x1f   :  { %313 = vmatpush.bf16.msra.mxu1 %v503_v33 }
  0x20   :  { %326 = vmatpush.bf16.msra.mxu2 %v511_v36 }
  0x21   :  { %339 = vmatpush.bf16.msra.mxu3 %v519_v37  ;;  %301 = vmatmul.bf16.vlgmr.msra.gmra.mxu0 %v93_v38 }
  0x22   :  { %314 = vmatmul.bf16.vlgmr.msra.gmra.mxu1 %v94_v39 }
  0x23   :  { %327 = vmatmul.bf16.vlgmr.msra.gmra.mxu2 %v95_v40 }
  0x24   :  { %340 = vmatmul.bf16.vlgmr.msra.gmra.mxu3 %v96_v41 }
  0x9e   :  { %v302_v43 = vpop.f32.mrf.mxu0 }
  0x9f   :  { %v315_v44 = vpop.f32.mrf.mxu1 }
  0xa0   :  { %v316_v45 = vadd.f32 %v315_v44, %v302_v43 }
  0xa6   :  { %v328_v46 = vpop.f32.mrf.mxu2  ;;  %v304_v49 = vpop.f32.mrf.mxu0 }
  0xa7   :  { %v341_v47 = vpop.f32.mrf.mxu3  ;;  %v329_v48 = vadd.f32 %v328_v46, %v316_v45  ;;  %v317_v50 = vpop.f32.mrf.mxu1 }
  0xa9   :  { %v342_v52 = vadd.f32 %v341_v47, %v329_v48 }
  0xab   :  { %v345_v53 = vadd.f32 %v342_v52, %v20_v51 }
  0xad   :  { %347 = vst.msk [vmem:[#allocation2] sm:$0xff] %vm18_vm0, %v345_v53 }
  0xae   :  { %v330_v54 = vpop.f32.mrf.mxu2 }
  0xaf   :  { %v343_v55 = vpop.f32.mrf.mxu3 }
  0xb4   :  { %v351_v57 = vld [vmem:[#allocation2] sm:$0xff] }
  0xb5   :  { %v356_v58 = vadd.f32 %v528_v56, %v351_v57 }
  0xb7   :  { %vm357_vm1 = vcmp.gt.f32.partialorder %v356_v58, 0.0  ;;  %v358_v59 = vmul.f32 0.2, %v356_v58 }
  0xb9   :  { %v359_v60 = vsel %vm357_vm1, %v356_v58, %v358_v59 }
  0xba   :  { %v360_v61 = vpack.c.bf16 %v359_v60, %v359_v60 }
  0xbc   :  { %362 = vst.msk [vmem:[%s661_s3] sm:$0xf] %vm361_vm2, %v360_v61 }

// kernel: forward.9
= control target key start
LH: loop header
LB: loop body
LE: loop exit
PB: predicated region body
PF: predicated region fallthrough
CT: control target
= control target key end

     0   :  { %vm18_vm0 = vcmask 261120   ;;  %vm605_vm2 = vcmask 257024   ;;  %s1102_s1 = inlined_call_operand.vmem [shape: bf16[896,32], index: 1, kind: input, shape index: {}]   ;;  %s1103_s0 = inlined_call_operand.vmem [shape: bf16[8,896], index: 0, kind: input, shape index: {}]   ;;  %s1104_s2 = inlined_call_operand.vmem [shape: f32[1,32], index: 2, kind: input, shape index: {}]   ;;  %s1105_s3 = inlined_call_operand.vmem [shape: bf16[8,32], index: 3, kind: output, shape index: {}]  }
   0x1   :  { %v842_v0 = vld [vmem:[%s1102_s1 + $0x38] sm:$0xff]  ;;  %v841_v3 = vld [vmem:[%s1102_s1 + $0x30] sm:$0xff]  ;;  %v840_v7 = vld [vmem:[%s1102_s1 + $0x28] sm:$0xff] }
   0x2   :  { %v850_v1 = vld [vmem:[%s1102_s1 + $0x78] sm:$0xff]  ;;  %498 = vmatpush.bf16.msra.mxu0 %v842_v0  ;;  %v849_v4 = vld [vmem:[%s1102_s1 + $0x70] sm:$0xff]  ;;  %v848_v8 = vld [vmem:[%s1102_s1 + $0x68] sm:$0xff] }
   0x3   :  { %v858_v2 = vld [vmem:[%s1102_s1 + $0xb8] sm:$0xff]  ;;  %511 = vmatpush.bf16.msra.mxu1 %v850_v1  ;;  %v857_v5 = vld [vmem:[%s1102_s1 + $0xb0] sm:$0xff]  ;;  %v856_v9 = vld [vmem:[%s1102_s1 + $0xa8] sm:$0xff] }
   0x4   :  { %524 = vmatpush.bf16.msra.mxu2 %v858_v2  ;;  %v866_v6 = vld [vmem:[%s1102_s1 + $0xf8] sm:$0xff]  ;;  %v865_v10 = vld [vmem:[%s1102_s1 + $0xf0] sm:$0xff]  ;;  %v839_v11 = vld [vmem:[%s1102_s1 + $0x20] sm:$0xff] }
   0x5   :  { %537 = vmatpush.bf16.msra.mxu3 %v866_v6  ;;  %v847_v12 = vld [vmem:[%s1102_s1 + $0x60] sm:$0xff]  ;;  %v864_v14 = vld [vmem:[%s1102_s1 + $0xe8] sm:$0xff]  ;;  %v838_v15 = vld [vmem:[%s1102_s1 + $0x18] sm:$0xff] }
   0x6   :  { %499 = vmatpush.bf16.msra.mxu0 %v841_v3  ;;  %v855_v13 = vld [vmem:[%s1102_s1 + $0xa0] sm:$0xff]  ;;  %v846_v16 = vld [vmem:[%s1102_s1 + $0x58] sm:$0xff]  ;;  %v837_v19 = vld [vmem:[%s1102_s1 + $0x10] sm:$0xff] }
   0x7   :  { %512 = vmatpush.bf16.msra.mxu1 %v849_v4  ;;  %v854_v17 = vld [vmem:[%s1102_s1 + $0x98] sm:$0xff]  ;;  %v863_v18 = vld [vmem:[%s1102_s1 + $0xe0] sm:$0xff]  ;;  %v845_v20 = vld [vmem:[%s1102_s1 + $0x50] sm:$0xff] }
   0x8   :  { %525 = vmatpush.bf16.msra.mxu2 %v857_v5  ;;  %v853_v21 = vld [vmem:[%s1102_s1 + $0x90] sm:$0xff]  ;;  %v862_v22 = vld [vmem:[%s1102_s1 + $0xd8] sm:$0xff]  ;;  %v836_v23 = vld [vmem:[%s1102_s1 + $0x8] sm:$0xff] }
   0x9   :  { %538 = vmatpush.bf16.msra.mxu3 %v865_v10  ;;  %v844_v24 = vld [vmem:[%s1102_s1 + $0x48] sm:$0xff]  ;;  %v21_v25 = vld [vmem:[%s1103_s0] sm:$0xff]  ;;  %v861_v27 = vld [vmem:[%s1102_s1 + $0xd0] sm:$0xff]  ;;  %v893_v10 = vmov 0.0  }
   0xa   :  { %500 = vmatpush.bf16.msra.mxu0 %v840_v7  ;;  %v852_v26 = vld [vmem:[%s1102_s1 + $0x88] sm:$0xff]  ;;  %v141_v29 = vunpack.c.l.b16 %v21_v25  ;;  %v835_v30 = vld [vmem:[%s1102_s1] sm:$0xff]  ;;  %v142_v33 = vunpack.c.h.b16 %v21_v25  ;;  %v874_v35 = vld [vmem:[%s1102_s1 + $0x138] sm:$0xff]  ;;  %19 = vst.msk [vmem:[#allocation2] sm:$0xff] %vm18_vm0, %v893_v10 }
   0xb   :  { %513 = vmatpush.bf16.msra.mxu1 %v848_v8  ;;  %v22_v28 = vld [vmem:[%s1103_s0 + $0x8] sm:$0xff]  ;;  %v843_v31 = vld [vmem:[%s1102_s1 + $0x40] sm:$0xff]  ;;  %v882_v36 = vld [vmem:[%s1102_s1 + $0x178] sm:$0xff] }
   0xc   :  { %526 = vmatpush.bf16.msra.mxu2 %v856_v9  ;;  %v143_v32 = vunpack.c.l.b16 %v22_v28  ;;  %v851_v34 = vld [vmem:[%s1102_s1 + $0x80] sm:$0xff]  ;;  %v890_v37 = vld [vmem:[%s1102_s1 + $0x1b8] sm:$0xff]  ;;  %v860_v38 = vld [vmem:[%s1102_s1 + $0xc8] sm:$0xff]  ;;  %v148_v39 = vpack.c.b16 %v141_v29, %v141_v29  ;;  %v149_v41 = vpack.c.b16 %v142_v33, %v142_v33  ;;  %v144_v46 = vunpack.c.h.b16 %v22_v28 }
   0xd   :  { %539 = vmatpush.bf16.msra.mxu3 %v864_v14  ;;  %v873_v42 = vld [vmem:[%s1102_s1 + $0x130] sm:$0xff]  ;;  %v859_v45 = vld [vmem:[%s1102_s1 + $0xc0] sm:$0xff]  ;;  %v872_v47 = vld [vmem:[%s1102_s1 + $0x128] sm:$0xff] }
   0xe   :  { %501 = vmatpush.bf16.msra.mxu0 %v839_v11  ;;  %v150_v40 = vpack.c.b16 %v143_v32, %v143_v32  ;;  %v881_v43 = vld [vmem:[%s1102_s1 + $0x170] sm:$0xff]  ;;  %v880_v48 = vld [vmem:[%s1102_s1 + $0x168] sm:$0xff]  ;;  %v151_v50 = vpack.c.b16 %v144_v46, %v144_v46  ;;  %v871_v51 = vld [vmem:[%s1102_s1 + $0x120] sm:$0xff] }
   0xf   :  { %514 = vmatpush.bf16.msra.mxu1 %v847_v12  ;;  %v889_v44 = vld [vmem:[%s1102_s1 + $0x1b0] sm:$0xff]  ;;  %v888_v49 = vld [vmem:[%s1102_s1 + $0x1a8] sm:$0xff]  ;;  %v879_v52 = vld [vmem:[%s1102_s1 + $0x160] sm:$0xff] }
  0x10   :  { %527 = vmatpush.bf16.msra.mxu2 %v855_v13  ;;  %v887_v53 = vld [vmem:[%s1102_s1 + $0x1a0] sm:$0xff]  ;;  %v870_v54 = vld [vmem:[%s1102_s1 + $0x118] sm:$0xff]  ;;  %v869_v57 = vld [vmem:[%s1102_s1 + $0x110] sm:$0xff] }
  0x11   :  { %540 = vmatpush.bf16.msra.mxu3 %v863_v18  ;;  %v878_v55 = vld [vmem:[%s1102_s1 + $0x158] sm:$0xff]  ;;  %v877_v58 = vld [vmem:[%s1102_s1 + $0x150] sm:$0xff]  ;;  %v868_v60 = vld [vmem:[%s1102_s1 + $0x108] sm:$0xff] }
  0x12   :  { %502 = vmatpush.bf16.msra.mxu0 %v838_v15  ;;  %v886_v56 = vld [vmem:[%s1102_s1 + $0x198] sm:$0xff]  ;;  %v885_v59 = vld [vmem:[%s1102_s1 + $0x190] sm:$0xff]  ;;  %v876_v62 = vld [vmem:[%s1102_s1 + $0x148] sm:$0xff] }
  0x13   :  { %515 = vmatpush.bf16.msra.mxu1 %v846_v16  ;;  %v23_v61 = vld [vmem:[%s1103_s0 + $0x10] sm:$0xff]  ;;  %v884_v63 = vld [vmem:[%s1102_s1 + $0x188] sm:$0xff]  ;;  %v24_v0 = vld [vmem:[%s1103_s0 + $0x18] sm:$0xf] }
  0x14   :  { %528 = vmatpush.bf16.msra.mxu2 %v854_v17  ;;  %v145_v1 = vunpack.c.l.b16 %v23_v61  ;;  %v867_v2 = vld [vmem:[%s1102_s1 + $0x100] sm:$0xff]  ;;  %v146_v3 = vunpack.c.h.b16 %v23_v61  ;;  %v147_v4 = vunpack.c.l.b16 %v24_v0 }
  0x15   :  { %541 = vmatpush.bf16.msra.mxu3 %v862_v22  ;;  %v875_v5 = vld [vmem:[%s1102_s1 + $0x140] sm:$0xff] }
  0x16   :  { %503 = vmatpush.bf16.msra.mxu0 %v837_v19  ;;  %v883_v6 = vld [vmem:[%s1102_s1 + $0x180] sm:$0xff]  ;;  %v152_v7 = vpack.c.b16 %v145_v1, %v145_v1  ;;  %v153_v8 = vpack.c.b16 %v146_v3, %v146_v3  ;;  %v154_v9 = vpack.c.b16 %v147_v4, %v147_v4 }
  0x17   :  { %516 = vmatpush.bf16.msra.mxu1 %v845_v20  ;;  %v892_v33 = vld [vmem:[%s1104_s2] ss:$0 sm:$0xff] }
  0x18   :  { %529 = vmatpush.bf16.msra.mxu2 %v853_v21 }
  0x19   :  { %542 = vmatpush.bf16.msra.mxu3 %v861_v27 }
  0x1a   :  { %504 = vmatpush.bf16.msra.mxu0 %v836_v23 }
  0x1b   :  { %517 = vmatpush.bf16.msra.mxu1 %v844_v24 }
  0x1c   :  { %530 = vmatpush.bf16.msra.mxu2 %v852_v26  ;;  %v20_v26 = vld [vmem:[#allocation2] sm:$0xff] }
  0x1d   :  { %543 = vmatpush.bf16.msra.mxu3 %v860_v38 }
  0x1e   :  { %505 = vmatpush.bf16.msra.mxu0 %v835_v30 }
  0x1f   :  { %518 = vmatpush.bf16.msra.mxu1 %v843_v31 }
  0x20   :  { %531 = vmatpush.bf16.msra.mxu2 %v851_v34 }
  0x21   :  { %506 = vmatmul.bf16.vlgmr.msra.gmra.mxu0 %v148_v39  ;;  %544 = vmatpush.bf16.msra.mxu3 %v859_v45 }
  0x22   :  { %550 = vmatpush.bf16.msrb.mxu0 %v874_v35  ;;  %519 = vmatmul.bf16.vlgmr.msra.gmra.mxu1 %v149_v41 }
  0x23   :  { %563 = vmatpush.bf16.msrb.mxu1 %v882_v36  ;;  %532 = vmatmul.bf16.vlgmr.msra.gmra.mxu2 %v150_v40 }
  0x24   :  { %576 = vmatpush.bf16.msrb.mxu2 %v890_v37  ;;  %545 = vmatmul.bf16.vlgmr.msra.gmra.mxu3 %v151_v50 }
  0x26   :  { %551 = vmatpush.bf16.msrb.mxu0 %v873_v42 }
  0x27   :  { %564 = vmatpush.bf16.msrb.mxu1 %v881_v43 }
  0x28   :  { %577 = vmatpush.bf16.msrb.mxu2 %v889_v44 }
  0x2a   :  { %552 = vmatpush.bf16.msrb.mxu0 %v872_v47 }
  0x2b   :  { %565 = vmatpush.bf16.msrb.mxu1 %v880_v48 }
  0x2c   :  { %578 = vmatpush.bf16.msrb.mxu2 %v888_v49 }
  0x2e   :  { %553 = vmatpush.bf16.msrb.mxu0 %v871_v51 }
  0x2f   :  { %566 = vmatpush.bf16.msrb.mxu1 %v879_v52 }
  0x30   :  { %579 = vmatpush.bf16.msrb.mxu2 %v887_v53 }
  0x32   :  { %554 = vmatpush.bf16.msrb.mxu0 %v870_v54 }
  0x33   :  { %567 = vmatpush.bf16.msrb.mxu1 %v878_v55 }
  0x34   :  { %580 = vmatpush.bf16.msrb.mxu2 %v886_v56 }
  0x36   :  { %555 = vmatpush.bf16.msrb.mxu0 %v869_v57 }
  0x37   :  { %568 = vmatpush.bf16.msrb.mxu1 %v877_v58 }
  0x38   :  { %581 = vmatpush.bf16.msrb.mxu2 %v885_v59 }
  0x3a   :  { %556 = vmatpush.bf16.msrb.mxu0 %v868_v60 }
  0x3b   :  { %569 = vmatpush.bf16.msrb.mxu1 %v876_v62 }
  0x3c   :  { %582 = vmatpush.bf16.msrb.mxu2 %v884_v63 }
  0x3e   :  { %557 = vmatpush.bf16.msrb.mxu0 %v867_v2 }
  0x3f   :  { %570 = vmatpush.bf16.msrb.mxu1 %v875_v5 }
  0x40   :  { %583 = vmatpush.bf16.msrb.mxu2 %v883_v6 }
  0x41   :  { %558 = vmatmul.bf16.vlgmr.msrb.gmra.mxu0 %v152_v7 }
  0x42   :  { %571 = vmatmul.bf16.vlgmr.msrb.gmra.mxu1 %v153_v8 }
  0x43   :  { %584 = vmatmul.bf16.vlgmr.msrb.gmra.mxu2 %v154_v9 }
  0x9e   :  { %v507_v11 = vpop.f32.mrf.mxu0 }
  0x9f   :  { %v520_v12 = vpop.f32.mrf.mxu1 }
  0xa0   :  { %v521_v18 = vadd.f32 %v520_v12, %v507_v11 }
  0xa6   :  { %v533_v13 = vpop.f32.mrf.mxu2  ;;  %v509_v14 = vpop.f32.mrf.mxu0 }
  0xa7   :  { %v522_v15 = vpop.f32.mrf.mxu1  ;;  %v546_v16 = vpop.f32.mrf.mxu3  ;;  %v534_v20 = vadd.f32 %v533_v13, %v521_v18 }
  0xa9   :  { %v547_v21 = vadd.f32 %v546_v16, %v534_v20 }
  0xae   :  { %v535_v17 = vpop.f32.mrf.mxu2 }
  0xaf   :  { %v548_v19 = vpop.f32.mrf.mxu3 }
  0xbe   :  { %v559_v22 = vpop.f32.mrf.mxu0 }
  0xbf   :  { %v572_v23 = vpop.f32.mrf.mxu1  ;;  %v560_v24 = vadd.f32 %v559_v22, %v547_v21 }
  0xc1   :  { %v573_v25 = vadd.f32 %v572_v23, %v560_v24 }
  0xc6   :  { %v585_v27 = vpop.f32.mrf.mxu2  ;;  %v561_v29 = vpop.f32.mrf.mxu0 }
  0xc7   :  { %v586_v28 = vadd.f32 %v585_v27, %v573_v25  ;;  %v574_v30 = vpop.f32.mrf.mxu1 }
  0xc9   :  { %v589_v31 = vadd.f32 %v586_v28, %v20_v26 }
  0xcb   :  { %591 = vst.msk [vmem:[#allocation2] sm:$0xff] %vm18_vm0, %v589_v31 }
  0xce   :  { %v587_v32 = vpop.f32.mrf.mxu2 }
  0xd2   :  { %v595_v34 = vld [vmem:[#allocation2] sm:$0xff] }
  0xd3   :  { %v600_v35 = vadd.f32 %v892_v33, %v595_v34 }
  0xd5   :  { %vm601_vm1 = vcmp.gt.f32.partialorder %v600_v35, 0.0  ;;  %v602_v36 = vmul.f32 0.2, %v600_v35 }
  0xd7   :  { %v603_v37 = vsel %vm601_vm1, %v600_v35, %v602_v36 }
  0xd8   :  { %v604_v38 = vpack.c.bf16 %v603_v37, %v603_v37 }
  0xda   :  { %606 = vst.msk [vmem:[%s1105_s3] sm:$0xf] %vm605_vm2, %v604_v38 }

// kernel: forward.11
= control target key start
LH: loop header
LB: loop body
LE: loop exit
PB: predicated region body
PF: predicated region fallthrough
CT: control target
= control target key end

     0   :  { %vm20_vm0 = vcmask 7168   ;;  %v406_v33 = vmov 0.0   ;;  %s514_s1 = inlined_call_operand.vmem [shape: bf16[384,1], index: 1, kind: input, shape index: {}]   ;;  %s515_s0 = inlined_call_operand.vmem [shape: bf16[8,384], index: 0, kind: input, shape index: {}]   ;;  %s516_s2 = inlined_call_operand.<no memory space> [shape: f32[1,1], index: 2, kind: input, shape index: {}]   ;;  %s517_s3 = inlined_call_operand.vmem [shape: f32[8,1], index: 3, kind: output, shape index: {}]  }
   0x1   :  { %v387_v0 = vld [vmem:[%s514_s1 + $0x38] sm:$0xff]  ;;  %v386_v3 = vld [vmem:[%s514_s1 + $0x30] sm:$0xff]  ;;  %v385_v6 = vld [vmem:[%s514_s1 + $0x28] sm:$0xff]  ;;  %v8_v32 = vstv %s516_s2  ;;  %21 = vst.msk [vmem:[#allocation2] sm:$0xff] %vm20_vm0, %v406_v33 }
   0x2   :  { %v395_v1 = vld [vmem:[%s514_s1 + $0x78] sm:$0xff]  ;;  %228 = vmatpush.bf16.msra.mxu0 %v387_v0  ;;  %v394_v4 = vld [vmem:[%s514_s1 + $0x70] sm:$0xff]  ;;  %v393_v7 = vld [vmem:[%s514_s1 + $0x68] sm:$0xff]  ;;  %9 = vst [vmem:[#allocation3] sm:$0x1] %v8_v32 }
   0x3   :  { %v403_v2 = vld [vmem:[%s514_s1 + $0xb8] sm:$0xff]  ;;  %241 = vmatpush.bf16.msra.mxu1 %v395_v1  ;;  %v402_v5 = vld [vmem:[%s514_s1 + $0xb0] sm:$0xff]  ;;  %v401_v8 = vld [vmem:[%s514_s1 + $0xa8] sm:$0xff] }
   0x4   :  { %254 = vmatpush.bf16.msra.mxu2 %v403_v2  ;;  %v384_v9 = vld [vmem:[%s514_s1 + $0x20] sm:$0xff]  ;;  %v383_v12 = vld [vmem:[%s514_s1 + $0x18] sm:$0xff]  ;;  %v382_v15 = vld [vmem:[%s514_s1 + $0x10] sm:$0xff] }
   0x5   :  { %v392_v10 = vld [vmem:[%s514_s1 + $0x60] sm:$0xff]  ;;  %v391_v13 = vld [vmem:[%s514_s1 + $0x58] sm:$0xff]  ;;  %v390_v16 = vld [vmem:[%s514_s1 + $0x50] sm:$0xff] }
   0x6   :  { %229 = vmatpush.bf16.msra.mxu0 %v386_v3  ;;  %v400_v11 = vld [vmem:[%s514_s1 + $0xa0] sm:$0xff]  ;;  %v399_v14 = vld [vmem:[%s514_s1 + $0x98] sm:$0xff]  ;;  %v398_v17 = vld [vmem:[%s514_s1 + $0x90] sm:$0xff] }
   0x7   :  { %242 = vmatpush.bf16.msra.mxu1 %v394_v4  ;;  %v381_v18 = vld [vmem:[%s514_s1 + $0x8] sm:$0xff]  ;;  %v23_v20 = vld [vmem:[%s515_s0] sm:$0xff] }
   0x8   :  { %255 = vmatpush.bf16.msra.mxu2 %v402_v5  ;;  %v389_v19 = vld [vmem:[%s514_s1 + $0x48] sm:$0xff]  ;;  %v75_v23 = vunpack.c.l.b16 %v23_v20  ;;  %v76_v24 = vunpack.c.h.b16 %v23_v20  ;;  %v380_v25 = vld [vmem:[%s514_s1] sm:$0xff] }
   0x9   :  { %v397_v21 = vld [vmem:[%s514_s1 + $0x88] sm:$0xff]  ;;  %v388_v26 = vld [vmem:[%s514_s1 + $0x40] sm:$0xff] }
   0xa   :  { %230 = vmatpush.bf16.msra.mxu0 %v385_v6  ;;  %v24_v22 = vld [vmem:[%s515_s0 + $0x8] sm:$0xf]  ;;  %v396_v28 = vld [vmem:[%s514_s1 + $0x80] sm:$0xff]  ;;  %v78_v29 = vpack.c.b16 %v75_v23, %v75_v23  ;;  %v79_v30 = vpack.c.b16 %v76_v24, %v76_v24 }
   0xb   :  { %243 = vmatpush.bf16.msra.mxu1 %v393_v7  ;;  %v77_v27 = vunpack.c.l.b16 %v24_v22  ;;  %v22_v37 = vld [vmem:[#allocation2] sm:$0xff]  ;;  %v405_v44 = vld [vmem:[#allocation3] ss:$0 sm:$0xff] }
   0xc   :  { %256 = vmatpush.bf16.msra.mxu2 %v401_v8 }
   0xd   :  { %v80_v31 = vpack.c.b16 %v77_v27, %v77_v27 }
   0xe   :  { %231 = vmatpush.bf16.msra.mxu0 %v384_v9 }
   0xf   :  { %244 = vmatpush.bf16.msra.mxu1 %v392_v10 }
  0x10   :  { %257 = vmatpush.bf16.msra.mxu2 %v400_v11 }
  0x12   :  { %232 = vmatpush.bf16.msra.mxu0 %v383_v12 }
  0x13   :  { %245 = vmatpush.bf16.msra.mxu1 %v391_v13 }
  0x14   :  { %258 = vmatpush.bf16.msra.mxu2 %v399_v14 }
  0x16   :  { %233 = vmatpush.bf16.msra.mxu0 %v382_v15 }
  0x17   :  { %246 = vmatpush.bf16.msra.mxu1 %v390_v16 }
  0x18   :  { %259 = vmatpush.bf16.msra.mxu2 %v398_v17 }
  0x1a   :  { %234 = vmatpush.bf16.msra.mxu0 %v381_v18 }
  0x1b   :  { %247 = vmatpush.bf16.msra.mxu1 %v389_v19 }
  0x1c   :  { %260 = vmatpush.bf16.msra.mxu2 %v397_v21 }
  0x1e   :  { %235 = vmatpush.bf16.msra.mxu0 %v380_v25 }
  0x1f   :  { %248 = vmatpush.bf16.msra.mxu1 %v388_v26 }
  0x20   :  { %261 = vmatpush.bf16.msra.mxu2 %v396_v28 }
  0x21   :  { %236 = vmatmul.bf16.vlgmr.msra.gmra.mxu0 %v78_v29 }
  0x22   :  { %249 = vmatmul.bf16.vlgmr.msra.gmra.mxu1 %v79_v30 }
  0x23   :  { %262 = vmatmul.bf16.vlgmr.msra.gmra.mxu2 %v80_v31 }
  0x9e   :  { %v237_v34 = vpop.f32.mrf.mxu0 }
  0x9f   :  { %v250_v35 = vpop.f32.mrf.mxu1 }
  0xa0   :  { %v251_v36 = vadd.f32 %v250_v35, %v237_v34 }
  0xa6   :  { %v263_v38 = vpop.f32.mrf.mxu2  ;;  %v239_v40 = vpop.f32.mrf.mxu0 }
  0xa7   :  { %v264_v39 = vadd.f32 %v263_v38, %v251_v36  ;;  %v252_v41 = vpop.f32.mrf.mxu1 }
  0xa9   :  { %v267_v42 = vadd.f32 %v264_v39, %v22_v37 }
  0xab   :  { %269 = vst.msk [vmem:[#allocation2] sm:$0xff] %vm20_vm0, %v267_v42 }
  0xae   :  { %v265_v43 = vpop.f32.mrf.mxu2 }
  0xb2   :  { %v273_v45 = vld [vmem:[#allocation2] sm:$0xff] }
  0xb3   :  { %v278_v46 = vadd.f32 %v405_v44, %v273_v45 }
  0xb5   :  { %279 = vst.msk [vmem:[%s517_s3] sm:$0xff] %vm20_vm0, %v278_v46 }

</bundles_post_ra>
